<compile_context>
chip_gen: v5e
topology: v5e:2x2
jax: 0.10.0
libtpu: 0.0.40
codegen_flags: <defaults>
</compile_context>

<pallas_src>
import functools
import math

import jax
import jax.numpy as jnp
from jax.experimental import pallas as pl
from jax.experimental.pallas import tpu as pltpu

EPS = 1e-6


# ----------------------------- in-kernel helpers ---------------------------- #
def _layernorm(x, gamma, beta):
    # gamma/beta: (1, D); x: (S, D). Matches torch: a*(x-mean)/(std+eps)+b with
    # unbiased std (eps added to std, not variance). Divide done on the EUP.
    d = x.shape[-1]
    mean = jnp.mean(x, axis=-1, keepdims=True)
    diff = x - mean
    var = jnp.sum(diff * diff, axis=-1, keepdims=True) * (1.0 / (d - 1))
    std = jnp.sqrt(var)
    inv = pl.reciprocal(std + EPS, approx=False)
    return gamma * diff * inv + beta


def _encoder_stack_kernel(x_ref, bias_ref,
                          wqkv_ref, bqkv_ref, wo_ref, bo_ref,
                          w1_ref, b1_ref, w2_ref, b2_ref,
                          g1_ref, be1_ref, g2_ref, be2_ref,
                          fg_ref, fb_ref,
                          o_ref, x_scr, *, n_heads, d_k, mm_dtype):
    layer = pl.program_id(1)
    n_layers = pl.num_programs(1)

    # Load the residual stream into VMEM scratch at the first layer; it stays
    # resident across the whole ("arbitrary") layer axis for this batch element.
    @pl.when(layer == 0)
    def _():
        x_scr[...] = x_ref[...]

    x = x_scr[...]                       # (S, D) f32 residual stream
    bias = bias_ref[...]                 # (1, S) additive key-mask bias (0 / -1e9)
    d_model = x.shape[-1]
    scale = 1.0 / math.sqrt(d_k)

    # ---- sublayer 0: pre-norm multi-head self-attention + residual ----
    xn = _layernorm(x, g1_ref[...], be1_ref[...])
    # Fused QKV projection: one (S, D) @ (D, 3D) MXU call, bf16-in / f32-acc.
    qkv = jnp.dot(xn.astype(mm_dtype), wqkv_ref[...],
                  preferred_element_type=jnp.float32) + bqkv_ref[...]     # (S, 3D) f32
    q = (qkv[:, :d_model] * scale).astype(mm_dtype)      # fold 1/sqrt(d_k) into q
    k = qkv[:, d_model:2 * d_model].astype(mm_dtype)
    v = qkv[:, 2 * d_model:].astype(mm_dtype)
    wo = wo_ref[...]

    # Per-head attention with static head slices (exact per-head FLOPs).  The
    # output projection is accumulated per head (ctx_h @ wo[h-rows]), which is
    # mathematically identical to concat-then-project with no extra MACs.
    attn = jnp.zeros_like(x)
    for h in range(n_heads):                             # static unroll (n_heads small)
        sl = slice(h * d_k, (h + 1) * d_k)
        sc = jax.lax.dot_general(q[:, sl], k[:, sl], (((1,), (1,)), ((), ())),
                                 preferred_element_type=jnp.float32)      # (S, S)
        p = jax.nn.softmax(sc + bias, axis=-1)                            # f32
        ctx = jnp.dot(p.astype(mm_dtype), v[:, sl],
                      preferred_element_type=jnp.float32)                 # (S, d_k)
        attn = attn + jnp.dot(ctx.astype(mm_dtype), wo[sl, :],
                              preferred_element_type=jnp.float32)         # (S, D)
    x = x + attn + bo_ref[...]           # dropout == identity

    # ---- sublayer 1: pre-norm feed-forward + residual ----
    xn2 = _layernorm(x, g2_ref[...], be2_ref[...])
    h1 = jnp.maximum(jnp.dot(xn2.astype(mm_dtype), w1_ref[...],
                             preferred_element_type=jnp.float32) + b1_ref[...], 0.0)
    ff = jnp.dot(h1.astype(mm_dtype), w2_ref[...],
                 preferred_element_type=jnp.float32) + b2_ref[...]
    x = x + ff
    x_scr[...] = x

    # ---- final LayerNorm of the Encoder, fused onto the last layer step ----
    @pl.when(layer == n_layers - 1)
    def _():
        o_ref[...] = _layernorm(x, fg_ref[...], fb_ref[...]).astype(o_ref.dtype)


# ------------------------------ pallas wrapper ------------------------------ #
def transformer_encoder(x, mask, layer_params, final_gamma, final_beta, n_heads,
                        matmul_dtype=jnp.bfloat16):
    """x: (B, S, D) f32; mask: (B, S) int (1 = keep, 0 = masked key position)."""
    B, S, D = x.shape
    L = len(layer_params)
    d_k = D // n_heads

    # Host-side packing: fuse Q/K/V weights, stack every per-layer parameter
    # along a leading layer axis, cast matmul weights to the MXU input dtype.
    def stack(name, cast=False):
        a = jnp.stack([p[name] for p in layer_params], axis=0)
        return a.astype(matmul_dtype) if cast else a

    wqkv = jnp.stack([jnp.concatenate([p["wq"], p["wk"], p["wv"]], axis=1)
                      for p in layer_params], axis=0).astype(matmul_dtype)   # (L, D, 3D)
    bqkv = jnp.stack([jnp.concatenate([p["bq"], p["bk"], p["bv"]], axis=1)
                      for p in layer_params], axis=0)                        # (L, 1, 3D) f32
    weights = [wqkv, bqkv,
               stack("wo", cast=True), stack("bo"),
               stack("w1", cast=True), stack("b1"),
               stack("w2", cast=True), stack("b2"),
               stack("g1"), stack("be1"), stack("g2"), stack("be2")]

    # Additive attention bias (0 keep / -1e9 masked), precomputed once.
    bias = jnp.where(mask[:, None, :] == 0, -1e9, 0.0).astype(jnp.float32)   # (B, 1, S)

    def layer_slab_spec(a):
        # Select this layer's weight slab with the second ("arbitrary") grid axis.
        return pl.BlockSpec((None,) + a.shape[1:], lambda b, l: (l, 0, 0))

    kernel = functools.partial(_encoder_stack_kernel,
                               n_heads=n_heads, d_k=d_k, mm_dtype=matmul_dtype)

    in_specs = ([pl.BlockSpec((None, S, D), lambda b, l: (b, 0, 0)),   # x
                 pl.BlockSpec((None, 1, S), lambda b, l: (b, 0, 0))]   # mask bias
                + [layer_slab_spec(w) for w in weights]
                + [pl.BlockSpec((1, D), lambda b, l: (0, 0)),          # final gamma
                   pl.BlockSpec((1, D), lambda b, l: (0, 0))])         # final beta

    return pl.pallas_call(
        kernel,
        out_shape=jax.ShapeDtypeStruct((B, S, D), x.dtype),
        grid_spec=pltpu.PrefetchScalarGridSpec(
            num_scalar_prefetch=0,
            grid=(B, L),                                   # batch parallel, layers carried
            in_specs=in_specs,
            out_specs=pl.BlockSpec((None, S, D), lambda b, l: (b, 0, 0)),
            scratch_shapes=[pltpu.VMEM((S, D), jnp.float32)],   # resident residual stream
        ),
        compiler_params=pltpu.CompilerParams(
            dimension_semantics=("parallel", "arbitrary"),
            vmem_limit_bytes=64 * 1024 * 1024,
        ),
    )(x, bias, *weights, final_gamma, final_beta)


# ------------------------------ parameter init ------------------------------ #
def _dense_init(key, fan_in, fan_out):
    k1, k2 = jax.random.split(key)
    bound = 1.0 / math.sqrt(fan_in)
    w = jax.random.uniform(k1, (fan_in, fan_out), jnp.float32, -bound, bound)
    b = jax.random.uniform(k2, (1, fan_out), jnp.float32, -bound, bound)
    return w, b


def init_params(key, d_model, d_ff, n_layers):
    layers = []
    for _ in range(n_layers):
        key, kq, kk, kv, ko, k1, k2 = jax.random.split(key, 7)
        p = {}
        p["wq"], p["bq"] = _dense_init(kq, d_model, d_model)
        p["wk"], p["bk"] = _dense_init(kk, d_model, d_model)
        p["wv"], p["bv"] = _dense_init(kv, d_model, d_model)
        p["wo"], p["bo"] = _dense_init(ko, d_model, d_model)
        p["w1"], p["b1"] = _dense_init(k1, d_model, d_ff)
        p["w2"], p["b2"] = _dense_init(k2, d_ff, d_model)
        p["g1"] = jnp.ones((1, d_model), jnp.float32)
        p["be1"] = jnp.zeros((1, d_model), jnp.float32)
        p["g2"] = jnp.ones((1, d_model), jnp.float32)
        p["be2"] = jnp.zeros((1, d_model), jnp.float32)
        layers.append(p)
    final_gamma = jnp.ones((1, d_model), jnp.float32)
    final_beta = jnp.zeros((1, d_model), jnp.float32)
    return layers, final_gamma, final_beta


# ------------------------------ pure-JAX reference --------------------------- #
def _ref_layernorm(x, gamma, beta):
    d = x.shape[-1]
    mean = jnp.mean(x, axis=-1, keepdims=True)
    var = jnp.sum((x - mean) ** 2, axis=-1, keepdims=True) / (d - 1)
    std = jnp.sqrt(var)
    return gamma * (x - mean) / (std + EPS) + beta


def _ref_layer(x, mask, p, n_heads):
    B, S, D = x.shape
    d_k = D // n_heads
    xn = _ref_layernorm(x, p["g1"], p["be1"])
    q = xn @ p["wq"] + p["bq"]
    k = xn @ p["wk"] + p["bk"]
    v = xn @ p["wv"] + p["bv"]
    q = q.reshape(B, S, n_heads, d_k).transpose(0, 2, 1, 3)
    k = k.reshape(B, S, n_heads, d_k).transpose(0, 2, 1, 3)
    v = v.reshape(B, S, n_heads, d_k).transpose(0, 2, 1, 3)
    scores = jnp.einsum("bhqd,bhkd->bhqk", q, k) / math.sqrt(d_k)
    scores = jnp.where(mask[:, None, None, :] == 0, -1e9, scores)
    p_attn = jax.nn.softmax(scores, axis=-1)
    out = jnp.einsum("bhqk,bhkd->bhqd", p_attn, v)
    out = out.transpose(0, 2, 1, 3).reshape(B, S, D)
    x = x + (out @ p["wo"] + p["bo"])
    xn2 = _ref_layernorm(x, p["g2"], p["be2"])
    ff = jnp.maximum(xn2 @ p["w1"] + p["b1"], 0.0) @ p["w2"] + p["b2"]
    return x + ff


def _ref_encoder(x, mask, layer_params, fg, fb, n_heads):
    for p in layer_params:
        x = _ref_layer(x, mask, p, n_heads)
    return _ref_layernorm(x, fg, fb)


# ----------------------------------- main ----------------------------------- #
if __name__ == "__main__":
    B, S, D, D_FF = 2, 8, 32, 64
    N_HEADS, N_LAYERS = 4, 2

    key = jax.random.PRNGKey(0)
    key, kx = jax.random.split(key)
    x = jax.random.normal(kx, (B, S, D), jnp.float32)

    mask = jnp.ones((B, S), jnp.int32)
    mask = mask.at[1, -3:].set(0)   # pad last 3 positions of batch element 1

    layer_params, fg, fb = init_params(key, D, D_FF, N_LAYERS)
    ref = _ref_encoder(x, mask, layer_params, fg, fb, N_HEADS)

    # Exactness check: f32-MXU path vs the pure-JAX reference (tight tolerance).
    out_f32 = jax.block_until_ready(
        transformer_encoder(x, mask, layer_params, fg, fb, N_HEADS,
                            matmul_dtype=jnp.float32))
    assert out_f32.shape == (B, S, D)
    assert jnp.allclose(out_f32, ref, atol=2e-3, rtol=2e-3), "f32 kernel mismatch vs reference"

    # Performance config: bf16 MXU inputs / f32 accumulation (per perf review);
    # tolerance widened accordingly vs the pure-f32 reference.
    out = jax.block_until_ready(
        transformer_encoder(x, mask, layer_params, fg, fb, N_HEADS,
                            matmul_dtype=jnp.bfloat16))
    assert out.shape == (B, S, D)
    assert jnp.allclose(out, ref, atol=5e-2, rtol=5e-2), "bf16 kernel mismatch vs reference"

    print("KERNEL_OK")
</pallas_src>

<mosaic_0001>
module attributes {stable_mosaic.version = 11 : i64} {
  func.func @_encoder_stack_kernel(%arg0: i32, %arg1: i32, %arg2: memref<1x8x32xf32, #tpu.memory_space<vmem>>, %arg3: memref<1x1x8xf32, #tpu.memory_space<vmem>>, %arg4: memref<1x32x96xf32, #tpu.memory_space<vmem>>, %arg5: memref<1x1x96xf32, #tpu.memory_space<vmem>>, %arg6: memref<1x32x32xf32, #tpu.memory_space<vmem>>, %arg7: memref<1x1x32xf32, #tpu.memory_space<vmem>>, %arg8: memref<1x32x64xf32, #tpu.memory_space<vmem>>, %arg9: memref<1x1x64xf32, #tpu.memory_space<vmem>>, %arg10: memref<1x64x32xf32, #tpu.memory_space<vmem>>, %arg11: memref<1x1x32xf32, #tpu.memory_space<vmem>>, %arg12: memref<1x1x32xf32, #tpu.memory_space<vmem>>, %arg13: memref<1x1x32xf32, #tpu.memory_space<vmem>>, %arg14: memref<1x1x32xf32, #tpu.memory_space<vmem>>, %arg15: memref<1x1x32xf32, #tpu.memory_space<vmem>>, %arg16: memref<1x32xf32, #tpu.memory_space<vmem>>, %arg17: memref<1x32xf32, #tpu.memory_space<vmem>>, %arg18: memref<1x8x32xf32, #tpu.memory_space<vmem>>, %arg19: memref<8x32xf32, #tpu.memory_space<vmem>>) attributes {dimension_semantics = [#tpu.dimension_semantics<parallel>, #tpu.dimension_semantics<arbitrary>], iteration_bounds = array<i64: 2, 2>, scalar_prefetch = 0 : i64, scratch_operands = 1 : i64, tpu.core_type = #tpu.core_type<tc>, window_params = [{transform_indices = @transform_0, window_bounds = array<i64: 1, 8, 32>}, {transform_indices = @transform_1, window_bounds = array<i64: 1, 1, 8>}, {transform_indices = @transform_2, window_bounds = array<i64: 1, 32, 96>}, {transform_indices = @transform_3, window_bounds = array<i64: 1, 1, 96>}, {transform_indices = @transform_4, window_bounds = array<i64: 1, 32, 32>}, {transform_indices = @transform_5, window_bounds = array<i64: 1, 1, 32>}, {transform_indices = @transform_6, window_bounds = array<i64: 1, 32, 64>}, {transform_indices = @transform_7, window_bounds = array<i64: 1, 1, 64>}, {transform_indices = @transform_8, window_bounds = array<i64: 1, 64, 32>}, {transform_indices = @transform_9, window_bounds = array<i64: 1, 1, 32>}, {transform_indices = @transform_10, window_bounds = array<i64: 1, 1, 32>}, {transform_indices = @transform_11, window_bounds = array<i64: 1, 1, 32>}, {transform_indices = @transform_12, window_bounds = array<i64: 1, 1, 32>}, {transform_indices = @transform_13, window_bounds = array<i64: 1, 1, 32>}, {pipeline_mode = #tpu.pipeline_mode<synchronous>, transform_indices = @transform_14, window_bounds = array<i64: 1, 32>}, {pipeline_mode = #tpu.pipeline_mode<synchronous>, transform_indices = @transform_15, window_bounds = array<i64: 1, 32>}, {transform_indices = @transform_16, window_bounds = array<i64: 1, 8, 32>}]} {
    %c0_i32 = arith.constant 0 : i32
    %0 = arith.cmpi eq, %arg1, %c0_i32 : i32
    %1 = arith.extui %0 : i1 to i32
    %c0_i32_0 = arith.constant 0 : i32
    %2 = arith.cmpi ne, %1, %c0_i32_0 : i32
    scf.if %2 {
      %c0_83 = arith.constant 0 : index
      %c0_84 = arith.constant 0 : index
      %c0_85 = arith.constant 0 : index
      %181 = vector.load %arg2[%c0_83, %c0_84, %c0_85] : memref<1x8x32xf32, #tpu.memory_space<vmem>>, vector<1x8x32xf32>
      %182 = vector.shape_cast %181 : vector<1x8x32xf32> to vector<8x32xf32>
      %c0_86 = arith.constant 0 : index
      %c0_87 = arith.constant 0 : index
      %183 = vector.load %arg19[%c0_86, %c0_87] : memref<8x32xf32, #tpu.memory_space<vmem>>, vector<8x32xf32>
      tpu.vector_store %arg19[%c0_86, %c0_87], %182 {strides = array<i32>} : memref<8x32xf32, #tpu.memory_space<vmem>>, vector<8x32xf32>,
    } else {
    }
    %c0 = arith.constant 0 : index
    %c0_1 = arith.constant 0 : index
    %3 = vector.load %arg19[%c0, %c0_1] : memref<8x32xf32, #tpu.memory_space<vmem>>, vector<8x32xf32>
    %c0_2 = arith.constant 0 : index
    %c0_3 = arith.constant 0 : index
    %c0_4 = arith.constant 0 : index
    %4 = vector.load %arg3[%c0_2, %c0_3, %c0_4] : memref<1x1x8xf32, #tpu.memory_space<vmem>>, vector<1x1x8xf32>
    %5 = vector.shape_cast %4 : vector<1x1x8xf32> to vector<1x8xf32>
    %c0_5 = arith.constant 0 : index
    %c0_6 = arith.constant 0 : index
    %c0_7 = arith.constant 0 : index
    %6 = vector.load %arg12[%c0_5, %c0_6, %c0_7] : memref<1x1x32xf32, #tpu.memory_space<vmem>>, vector<1x1x32xf32>
    %7 = vector.shape_cast %6 : vector<1x1x32xf32> to vector<1x32xf32>
    %c0_8 = arith.constant 0 : index
    %c0_9 = arith.constant 0 : index
    %c0_10 = arith.constant 0 : index
    %8 = vector.load %arg13[%c0_8, %c0_9, %c0_10] : memref<1x1x32xf32, #tpu.memory_space<vmem>>, vector<1x1x32xf32>
    %9 = vector.shape_cast %8 : vector<1x1x32xf32> to vector<1x32xf32>
    %cst = arith.constant dense<0.000000e+00> : vector<8xf32>
    %10 = vector.multi_reduction <add>, %3, %cst [1] : vector<8x32xf32> to vector<8xf32>
    %11 = vector.shape_cast %10 : vector<8xf32> to vector<8x1xf32>
    %cst_11 = arith.constant 3.200000e+01 : f32
    %12 = vector.broadcast %cst_11 : f32 to vector<8x1xf32>
    %13 = arith.divf %11, %12 : vector<8x1xf32>
    %14 = vector.broadcast %13 : vector<8x1xf32> to vector<8x32xf32>
    %15 = arith.subf %3, %14 : vector<8x32xf32>
    %16 = arith.mulf %15, %15 : vector<8x32xf32>
    %cst_12 = arith.constant dense<0.000000e+00> : vector<8xf32>
    %17 = vector.multi_reduction <add>, %16, %cst_12 [1] : vector<8x32xf32> to vector<8xf32>
    %18 = vector.shape_cast %17 : vector<8xf32> to vector<8x1xf32>
    %cst_13 = arith.constant 0.0322580636 : f32
    %19 = vector.broadcast %cst_13 : f32 to vector<8x1xf32>
    %20 = arith.mulf %18, %19 : vector<8x1xf32>
    %21 = math.sqrt %20 : vector<8x1xf32>
    %cst_14 = arith.constant 9.99999997E-7 : f32
    %22 = vector.broadcast %cst_14 : f32 to vector<8x1xf32>
    %23 = arith.addf %21, %22 : vector<8x1xf32>
    %24 = tpu.reciprocal %23 : vector<8x1xf32> -> vector<8x1xf32>
    %25 = vector.broadcast %7 : vector<1x32xf32> to vector<8x32xf32>
    %26 = arith.mulf %25, %15 : vector<8x32xf32>
    %27 = vector.broadcast %24 : vector<8x1xf32> to vector<8x32xf32>
    %28 = arith.mulf %26, %27 : vector<8x32xf32>
    %29 = vector.broadcast %9 : vector<1x32xf32> to vector<8x32xf32>
    %30 = arith.addf %28, %29 : vector<8x32xf32>
    %c0_15 = arith.constant 0 : index
    %c0_16 = arith.constant 0 : index
    %c0_17 = arith.constant 0 : index
    %31 = vector.load %arg4[%c0_15, %c0_16, %c0_17] : memref<1x32x96xf32, #tpu.memory_space<vmem>>, vector<1x32x96xf32>
    %32 = vector.shape_cast %31 : vector<1x32x96xf32> to vector<32x96xf32>
    %cst_18 = arith.constant dense<0.000000e+00> : vector<8x96xf32>
    %33 = tpu.matmul %30, %32, %cst_18 {dimension_numbers = #tpu.dot_dimension_numbers<[1], [0], [0], [1], [0, 0, 1, 1], [], []>} : vector<8x32xf32>, vector<32x96xf32>, vector<8x96xf32> -> vector<8x96xf32>
    %c0_19 = arith.constant 0 : index
    %c0_20 = arith.constant 0 : index
    %c0_21 = arith.constant 0 : index
    %34 = vector.load %arg5[%c0_19, %c0_20, %c0_21] : memref<1x1x96xf32, #tpu.memory_space<vmem>>, vector<1x1x96xf32>
    %35 = vector.shape_cast %34 : vector<1x1x96xf32> to vector<1x96xf32>
    %36 = vector.broadcast %35 : vector<1x96xf32> to vector<8x96xf32>
    %37 = arith.addf %33, %36 : vector<8x96xf32>
    %38 = vector.extract_strided_slice %37 {offsets = [0, 0], sizes = [8, 32], strides = [1, 1]} : vector<8x96xf32> to vector<8x32xf32>
    %cst_22 = arith.constant 0.353553385 : f32
    %39 = vector.broadcast %cst_22 : f32 to vector<8x32xf32>
    %40 = arith.mulf %38, %39 : vector<8x32xf32>
    %41 = vector.extract_strided_slice %37 {offsets = [0, 32], sizes = [8, 32], strides = [1, 1]} : vector<8x96xf32> to vector<8x32xf32>
    %42 = vector.extract_strided_slice %37 {offsets = [0, 64], sizes = [8, 32], strides = [1, 1]} : vector<8x96xf32> to vector<8x32xf32>
    %c0_23 = arith.constant 0 : index
    %c0_24 = arith.constant 0 : index
    %c0_25 = arith.constant 0 : index
    %43 = vector.load %arg6[%c0_23, %c0_24, %c0_25] : memref<1x32x32xf32, #tpu.memory_space<vmem>>, vector<1x32x32xf32>
    %44 = vector.shape_cast %43 : vector<1x32x32xf32> to vector<32x32xf32>
    %cst_26 = arith.constant 0.000000e+00 : f32
    %45 = vector.broadcast %cst_26 : f32 to vector<8x32xf32>
    %46 = vector.extract_strided_slice %40 {offsets = [0, 0], sizes = [8, 8], strides = [1, 1]} : vector<8x32xf32> to vector<8x8xf32>
    %47 = vector.extract_strided_slice %41 {offsets = [0, 0], sizes = [8, 8], strides = [1, 1]} : vector<8x32xf32> to vector<8x8xf32>
    %cst_27 = arith.constant dense<0.000000e+00> : vector<8x8xf32>
    %48 = tpu.matmul %46, %47, %cst_27 {dimension_numbers = #tpu.dot_dimension_numbers<[1], [1], [0], [0], [0, 0, 1, 0], [], []>} : vector<8x8xf32>, vector<8x8xf32>, vector<8x8xf32> -> vector<8x8xf32>
    %49 = vector.broadcast %5 : vector<1x8xf32> to vector<8x8xf32>
    %50 = arith.addf %48, %49 : vector<8x8xf32>
    %cst_28 = arith.constant dense<0xFF800000> : vector<8xf32>
    %51 = vector.multi_reduction <maximumf>, %50, %cst_28 [1] : vector<8x8xf32> to vector<8xf32>
    %cst_29 = arith.constant 0xFF800000 : f32
    %52 = vector.broadcast %cst_29 : f32 to vector<8xf32>
    %53 = arith.maximumf %52, %51 : vector<8xf32>
    %54 = vector.shape_cast %53 : vector<8xf32> to vector<8x1xf32>
    %55 = vector.broadcast %54 : vector<8x1xf32> to vector<8x8xf32>
    %56 = arith.subf %50, %55 : vector<8x8xf32>
    %57 = math.exp %56 : vector<8x8xf32>
    %cst_30 = arith.constant dense<0.000000e+00> : vector<8xf32>
    %58 = vector.multi_reduction <add>, %57, %cst_30 [1] : vector<8x8xf32> to vector<8xf32>
    %59 = vector.shape_cast %58 : vector<8xf32> to vector<8x1xf32>
    %60 = vector.broadcast %59 : vector<8x1xf32> to vector<8x8xf32>
    %61 = arith.divf %57, %60 : vector<8x8xf32>
    %62 = vector.extract_strided_slice %42 {offsets = [0, 0], sizes = [8, 8], strides = [1, 1]} : vector<8x32xf32> to vector<8x8xf32>
    %cst_31 = arith.constant dense<0.000000e+00> : vector<8x8xf32>
    %63 = tpu.matmul %61, %62, %cst_31 {dimension_numbers = #tpu.dot_dimension_numbers<[1], [0], [0], [1], [0, 0, 1, 1], [], []>} : vector<8x8xf32>, vector<8x8xf32>, vector<8x8xf32> -> vector<8x8xf32>
    %64 = vector.extract_strided_slice %44 {offsets = [0, 0], sizes = [8, 32], strides = [1, 1]} : vector<32x32xf32> to vector<8x32xf32>
    %cst_32 = arith.constant dense<0.000000e+00> : vector<8x32xf32>
    %65 = tpu.matmul %63, %64, %cst_32 {dimension_numbers = #tpu.dot_dimension_numbers<[1], [0], [0], [1], [0, 0, 1, 1], [], []>} : vector<8x8xf32>, vector<8x32xf32>, vector<8x32xf32> -> vector<8x32xf32>
    %66 = arith.addf %45, %65 : vector<8x32xf32>
    %67 = vector.extract_strided_slice %40 {offsets = [0, 8], sizes = [8, 8], strides = [1, 1]} : vector<8x32xf32> to vector<8x8xf32>
    %68 = vector.extract_strided_slice %41 {offsets = [0, 8], sizes = [8, 8], strides = [1, 1]} : vector<8x32xf32> to vector<8x8xf32>
    %cst_33 = arith.constant dense<0.000000e+00> : vector<8x8xf32>
    %69 = tpu.matmul %67, %68, %cst_33 {dimension_numbers = #tpu.dot_dimension_numbers<[1], [1], [0], [0], [0, 0, 1, 0], [], []>} : vector<8x8xf32>, vector<8x8xf32>, vector<8x8xf32> -> vector<8x8xf32>
    %70 = vector.broadcast %5 : vector<1x8xf32> to vector<8x8xf32>
    %71 = arith.addf %69, %70 : vector<8x8xf32>
    %cst_34 = arith.constant dense<0xFF800000> : vector<8xf32>
    %72 = vector.multi_reduction <maximumf>, %71, %cst_34 [1] : vector<8x8xf32> to vector<8xf32>
    %cst_35 = arith.constant 0xFF800000 : f32
    %73 = vector.broadcast %cst_35 : f32 to vector<8xf32>
    %74 = arith.maximumf %73, %72 : vector<8xf32>
    %75 = vector.shape_cast %74 : vector<8xf32> to vector<8x1xf32>
    %76 = vector.broadcast %75 : vector<8x1xf32> to vector<8x8xf32>
    %77 = arith.subf %71, %76 : vector<8x8xf32>
    %78 = math.exp %77 : vector<8x8xf32>
    %cst_36 = arith.constant dense<0.000000e+00> : vector<8xf32>
    %79 = vector.multi_reduction <add>, %78, %cst_36 [1] : vector<8x8xf32> to vector<8xf32>
    %80 = vector.shape_cast %79 : vector<8xf32> to vector<8x1xf32>
    %81 = vector.broadcast %80 : vector<8x1xf32> to vector<8x8xf32>
    %82 = arith.divf %78, %81 : vector<8x8xf32>
    %83 = vector.extract_strided_slice %42 {offsets = [0, 8], sizes = [8, 8], strides = [1, 1]} : vector<8x32xf32> to vector<8x8xf32>
    %cst_37 = arith.constant dense<0.000000e+00> : vector<8x8xf32>
    %84 = tpu.matmul %82, %83, %cst_37 {dimension_numbers = #tpu.dot_dimension_numbers<[1], [0], [0], [1], [0, 0, 1, 1], [], []>} : vector<8x8xf32>, vector<8x8xf32>, vector<8x8xf32> -> vector<8x8xf32>
    %85 = vector.extract_strided_slice %44 {offsets = [8, 0], sizes = [8, 32], strides = [1, 1]} : vector<32x32xf32> to vector<8x32xf32>
    %cst_38 = arith.constant dense<0.000000e+00> : vector<8x32xf32>
    %86 = tpu.matmul %84, %85, %cst_38 {dimension_numbers = #tpu.dot_dimension_numbers<[1], [0], [0], [1], [0, 0, 1, 1], [], []>} : vector<8x8xf32>, vector<8x32xf32>, vector<8x32xf32> -> vector<8x32xf32>
    %87 = arith.addf %66, %86 : vector<8x32xf32>
    %88 = vector.extract_strided_slice %40 {offsets = [0, 16], sizes = [8, 8], strides = [1, 1]} : vector<8x32xf32> to vector<8x8xf32>
    %89 = vector.extract_strided_slice %41 {offsets = [0, 16], sizes = [8, 8], strides = [1, 1]} : vector<8x32xf32> to vector<8x8xf32>
    %cst_39 = arith.constant dense<0.000000e+00> : vector<8x8xf32>
    %90 = tpu.matmul %88, %89, %cst_39 {dimension_numbers = #tpu.dot_dimension_numbers<[1], [1], [0], [0], [0, 0, 1, 0], [], []>} : vector<8x8xf32>, vector<8x8xf32>, vector<8x8xf32> -> vector<8x8xf32>
    %91 = vector.broadcast %5 : vector<1x8xf32> to vector<8x8xf32>
    %92 = arith.addf %90, %91 : vector<8x8xf32>
    %cst_40 = arith.constant dense<0xFF800000> : vector<8xf32>
    %93 = vector.multi_reduction <maximumf>, %92, %cst_40 [1] : vector<8x8xf32> to vector<8xf32>
    %cst_41 = arith.constant 0xFF800000 : f32
    %94 = vector.broadcast %cst_41 : f32 to vector<8xf32>
    %95 = arith.maximumf %94, %93 : vector<8xf32>
    %96 = vector.shape_cast %95 : vector<8xf32> to vector<8x1xf32>
    %97 = vector.broadcast %96 : vector<8x1xf32> to vector<8x8xf32>
    %98 = arith.subf %92, %97 : vector<8x8xf32>
    %99 = math.exp %98 : vector<8x8xf32>
    %cst_42 = arith.constant dense<0.000000e+00> : vector<8xf32>
    %100 = vector.multi_reduction <add>, %99, %cst_42 [1] : vector<8x8xf32> to vector<8xf32>
    %101 = vector.shape_cast %100 : vector<8xf32> to vector<8x1xf32>
    %102 = vector.broadcast %101 : vector<8x1xf32> to vector<8x8xf32>
    %103 = arith.divf %99, %102 : vector<8x8xf32>
    %104 = vector.extract_strided_slice %42 {offsets = [0, 16], sizes = [8, 8], strides = [1, 1]} : vector<8x32xf32> to vector<8x8xf32>
    %cst_43 = arith.constant dense<0.000000e+00> : vector<8x8xf32>
    %105 = tpu.matmul %103, %104, %cst_43 {dimension_numbers = #tpu.dot_dimension_numbers<[1], [0], [0], [1], [0, 0, 1, 1], [], []>} : vector<8x8xf32>, vector<8x8xf32>, vector<8x8xf32> -> vector<8x8xf32>
    %106 = vector.extract_strided_slice %44 {offsets = [16, 0], sizes = [8, 32], strides = [1, 1]} : vector<32x32xf32> to vector<8x32xf32>
    %cst_44 = arith.constant dense<0.000000e+00> : vector<8x32xf32>
    %107 = tpu.matmul %105, %106, %cst_44 {dimension_numbers = #tpu.dot_dimension_numbers<[1], [0], [0], [1], [0, 0, 1, 1], [], []>} : vector<8x8xf32>, vector<8x32xf32>, vector<8x32xf32> -> vector<8x32xf32>
    %108 = arith.addf %87, %107 : vector<8x32xf32>
    %109 = vector.extract_strided_slice %40 {offsets = [0, 24], sizes = [8, 8], strides = [1, 1]} : vector<8x32xf32> to vector<8x8xf32>
    %110 = vector.extract_strided_slice %41 {offsets = [0, 24], sizes = [8, 8], strides = [1, 1]} : vector<8x32xf32> to vector<8x8xf32>
    %cst_45 = arith.constant dense<0.000000e+00> : vector<8x8xf32>
    %111 = tpu.matmul %109, %110, %cst_45 {dimension_numbers = #tpu.dot_dimension_numbers<[1], [1], [0], [0], [0, 0, 1, 0], [], []>} : vector<8x8xf32>, vector<8x8xf32>, vector<8x8xf32> -> vector<8x8xf32>
    %112 = vector.broadcast %5 : vector<1x8xf32> to vector<8x8xf32>
    %113 = arith.addf %111, %112 : vector<8x8xf32>
    %cst_46 = arith.constant dense<0xFF800000> : vector<8xf32>
    %114 = vector.multi_reduction <maximumf>, %113, %cst_46 [1] : vector<8x8xf32> to vector<8xf32>
    %cst_47 = arith.constant 0xFF800000 : f32
    %115 = vector.broadcast %cst_47 : f32 to vector<8xf32>
    %116 = arith.maximumf %115, %114 : vector<8xf32>
    %117 = vector.shape_cast %116 : vector<8xf32> to vector<8x1xf32>
    %118 = vector.broadcast %117 : vector<8x1xf32> to vector<8x8xf32>
    %119 = arith.subf %113, %118 : vector<8x8xf32>
    %120 = math.exp %119 : vector<8x8xf32>
    %cst_48 = arith.constant dense<0.000000e+00> : vector<8xf32>
    %121 = vector.multi_reduction <add>, %120, %cst_48 [1] : vector<8x8xf32> to vector<8xf32>
    %122 = vector.shape_cast %121 : vector<8xf32> to vector<8x1xf32>
    %123 = vector.broadcast %122 : vector<8x1xf32> to vector<8x8xf32>
    %124 = arith.divf %120, %123 : vector<8x8xf32>
    %125 = vector.extract_strided_slice %42 {offsets = [0, 24], sizes = [8, 8], strides = [1, 1]} : vector<8x32xf32> to vector<8x8xf32>
    %cst_49 = arith.constant dense<0.000000e+00> : vector<8x8xf32>
    %126 = tpu.matmul %124, %125, %cst_49 {dimension_numbers = #tpu.dot_dimension_numbers<[1], [0], [0], [1], [0, 0, 1, 1], [], []>} : vector<8x8xf32>, vector<8x8xf32>, vector<8x8xf32> -> vector<8x8xf32>
    %127 = vector.extract_strided_slice %44 {offsets = [24, 0], sizes = [8, 32], strides = [1, 1]} : vector<32x32xf32> to vector<8x32xf32>
    %cst_50 = arith.constant dense<0.000000e+00> : vector<8x32xf32>
    %128 = tpu.matmul %126, %127, %cst_50 {dimension_numbers = #tpu.dot_dimension_numbers<[1], [0], [0], [1], [0, 0, 1, 1], [], []>} : vector<8x8xf32>, vector<8x32xf32>, vector<8x32xf32> -> vector<8x32xf32>
    %129 = arith.addf %108, %128 : vector<8x32xf32>
    %130 = arith.addf %3, %129 : vector<8x32xf32>
    %c0_51 = arith.constant 0 : index
    %c0_52 = arith.constant 0 : index
    %c0_53 = arith.constant 0 : index
    %131 = vector.load %arg7[%c0_51, %c0_52, %c0_53] : memref<1x1x32xf32, #tpu.memory_space<vmem>>, vector<1x1x32xf32>
    %132 = vector.shape_cast %131 : vector<1x1x32xf32> to vector<1x32xf32>
    %133 = vector.broadcast %132 : vector<1x32xf32> to vector<8x32xf32>
    %134 = arith.addf %130, %133 : vector<8x32xf32>
    %c0_54 = arith.constant 0 : index
    %c0_55 = arith.constant 0 : index
    %c0_56 = arith.constant 0 : index
    %135 = vector.load %arg14[%c0_54, %c0_55, %c0_56] : memref<1x1x32xf32, #tpu.memory_space<vmem>>, vector<1x1x32xf32>
    %136 = vector.shape_cast %135 : vector<1x1x32xf32> to vector<1x32xf32>
    %c0_57 = arith.constant 0 : index
    %c0_58 = arith.constant 0 : index
    %c0_59 = arith.constant 0 : index
    %137 = vector.load %arg15[%c0_57, %c0_58, %c0_59] : memref<1x1x32xf32, #tpu.memory_space<vmem>>, vector<1x1x32xf32>
    %138 = vector.shape_cast %137 : vector<1x1x32xf32> to vector<1x32xf32>
    %cst_60 = arith.constant dense<0.000000e+00> : vector<8xf32>
    %139 = vector.multi_reduction <add>, %134, %cst_60 [1] : vector<8x32xf32> to vector<8xf32>
    %140 = vector.shape_cast %139 : vector<8xf32> to vector<8x1xf32>
    %cst_61 = arith.constant 3.200000e+01 : f32
    %141 = vector.broadcast %cst_61 : f32 to vector<8x1xf32>
    %142 = arith.divf %140, %141 : vector<8x1xf32>
    %143 = vector.broadcast %142 : vector<8x1xf32> to vector<8x32xf32>
    %144 = arith.subf %134, %143 : vector<8x32xf32>
    %145 = arith.mulf %144, %144 : vector<8x32xf32>
    %cst_62 = arith.constant dense<0.000000e+00> : vector<8xf32>
    %146 = vector.multi_reduction <add>, %145, %cst_62 [1] : vector<8x32xf32> to vector<8xf32>
    %147 = vector.shape_cast %146 : vector<8xf32> to vector<8x1xf32>
    %cst_63 = arith.constant 0.0322580636 : f32
    %148 = vector.broadcast %cst_63 : f32 to vector<8x1xf32>
    %149 = arith.mulf %147, %148 : vector<8x1xf32>
    %150 = math.sqrt %149 : vector<8x1xf32>
    %cst_64 = arith.constant 9.99999997E-7 : f32
    %151 = vector.broadcast %cst_64 : f32 to vector<8x1xf32>
    %152 = arith.addf %150, %151 : vector<8x1xf32>
    %153 = tpu.reciprocal %152 : vector<8x1xf32> -> vector<8x1xf32>
    %154 = vector.broadcast %136 : vector<1x32xf32> to vector<8x32xf32>
    %155 = arith.mulf %154, %144 : vector<8x32xf32>
    %156 = vector.broadcast %153 : vector<8x1xf32> to vector<8x32xf32>
    %157 = arith.mulf %155, %156 : vector<8x32xf32>
    %158 = vector.broadcast %138 : vector<1x32xf32> to vector<8x32xf32>
    %159 = arith.addf %157, %158 : vector<8x32xf32>
    %c0_65 = arith.constant 0 : index
    %c0_66 = arith.constant 0 : index
    %c0_67 = arith.constant 0 : index
    %160 = vector.load %arg8[%c0_65, %c0_66, %c0_67] : memref<1x32x64xf32, #tpu.memory_space<vmem>>, vector<1x32x64xf32>
    %161 = vector.shape_cast %160 : vector<1x32x64xf32> to vector<32x64xf32>
    %cst_68 = arith.constant dense<0.000000e+00> : vector<8x64xf32>
    %162 = tpu.matmul %159, %161, %cst_68 {dimension_numbers = #tpu.dot_dimension_numbers<[1], [0], [0], [1], [0, 0, 1, 1], [], []>} : vector<8x32xf32>, vector<32x64xf32>, vector<8x64xf32> -> vector<8x64xf32>
    %c0_69 = arith.constant 0 : index
    %c0_70 = arith.constant 0 : index
    %c0_71 = arith.constant 0 : index
    %163 = vector.load %arg9[%c0_69, %c0_70, %c0_71] : memref<1x1x64xf32, #tpu.memory_space<vmem>>, vector<1x1x64xf32>
    %164 = vector.shape_cast %163 : vector<1x1x64xf32> to vector<1x64xf32>
    %165 = vector.broadcast %164 : vector<1x64xf32> to vector<8x64xf32>
    %166 = arith.addf %162, %165 : vector<8x64xf32>
    %cst_72 = arith.constant 0.000000e+00 : f32
    %167 = vector.broadcast %cst_72 : f32 to vector<8x64xf32>
    %168 = arith.maximumf %166, %167 : vector<8x64xf32>
    %c0_73 = arith.constant 0 : index
    %c0_74 = arith.constant 0 : index
    %c0_75 = arith.constant 0 : index
    %169 = vector.load %arg10[%c0_73, %c0_74, %c0_75] : memref<1x64x32xf32, #tpu.memory_space<vmem>>, vector<1x64x32xf32>
    %170 = vector.shape_cast %169 : vector<1x64x32xf32> to vector<64x32xf32>
    %cst_76 = arith.constant dense<0.000000e+00> : vector<8x32xf32>
    %171 = tpu.matmul %168, %170, %cst_76 {dimension_numbers = #tpu.dot_dimension_numbers<[1], [0], [0], [1], [0, 0, 1, 1], [], []>} : vector<8x64xf32>, vector<64x32xf32>, vector<8x32xf32> -> vector<8x32xf32>
    %c0_77 = arith.constant 0 : index
    %c0_78 = arith.constant 0 : index
    %c0_79 = arith.constant 0 : index
    %172 = vector.load %arg11[%c0_77, %c0_78, %c0_79] : memref<1x1x32xf32, #tpu.memory_space<vmem>>, vector<1x1x32xf32>
    %173 = vector.shape_cast %172 : vector<1x1x32xf32> to vector<1x32xf32>
    %174 = vector.broadcast %173 : vector<1x32xf32> to vector<8x32xf32>
    %175 = arith.addf %171, %174 : vector<8x32xf32>
    %176 = arith.addf %134, %175 : vector<8x32xf32>
    %c0_80 = arith.constant 0 : index
    %c0_81 = arith.constant 0 : index
    %177 = vector.load %arg19[%c0_80, %c0_81] : memref<8x32xf32, #tpu.memory_space<vmem>>, vector<8x32xf32>
    tpu.vector_store %arg19[%c0_80, %c0_81], %176 {strides = array<i32>} : memref<8x32xf32, #tpu.memory_space<vmem>>, vector<8x32xf32>,
    %c1_i32 = arith.constant 1 : i32
    %178 = arith.cmpi eq, %arg1, %c1_i32 : i32
    %179 = arith.extui %178 : i1 to i32
    %c0_i32_82 = arith.constant 0 : i32
    %180 = arith.cmpi ne, %179, %c0_i32_82 : i32
    scf.if %180 {
      %c0_83 = arith.constant 0 : index
      %c0_84 = arith.constant 0 : index
      %181 = vector.load %arg16[%c0_83, %c0_84] : memref<1x32xf32, #tpu.memory_space<vmem>>, vector<1x32xf32>
      %c0_85 = arith.constant 0 : index
      %c0_86 = arith.constant 0 : index
      %182 = vector.load %arg17[%c0_85, %c0_86] : memref<1x32xf32, #tpu.memory_space<vmem>>, vector<1x32xf32>
      %cst_87 = arith.constant dense<0.000000e+00> : vector<8xf32>
      %183 = vector.multi_reduction <add>, %176, %cst_87 [1] : vector<8x32xf32> to vector<8xf32>
      %184 = vector.shape_cast %183 : vector<8xf32> to vector<8x1xf32>
      %cst_88 = arith.constant 3.200000e+01 : f32
      %185 = vector.broadcast %cst_88 : f32 to vector<8x1xf32>
      %186 = arith.divf %184, %185 : vector<8x1xf32>
      %187 = vector.broadcast %186 : vector<8x1xf32> to vector<8x32xf32>
      %188 = arith.subf %176, %187 : vector<8x32xf32>
      %189 = arith.mulf %188, %188 : vector<8x32xf32>
      %cst_89 = arith.constant dense<0.000000e+00> : vector<8xf32>
      %190 = vector.multi_reduction <add>, %189, %cst_89 [1] : vector<8x32xf32> to vector<8xf32>
      %191 = vector.shape_cast %190 : vector<8xf32> to vector<8x1xf32>
      %cst_90 = arith.constant 0.0322580636 : f32
      %192 = vector.broadcast %cst_90 : f32 to vector<8x1xf32>
      %193 = arith.mulf %191, %192 : vector<8x1xf32>
      %194 = math.sqrt %193 : vector<8x1xf32>
      %cst_91 = arith.constant 9.99999997E-7 : f32
      %195 = vector.broadcast %cst_91 : f32 to vector<8x1xf32>
      %196 = arith.addf %194, %195 : vector<8x1xf32>
      %197 = tpu.reciprocal %196 : vector<8x1xf32> -> vector<8x1xf32>
      %198 = vector.broadcast %181 : vector<1x32xf32> to vector<8x32xf32>
      %199 = arith.mulf %198, %188 : vector<8x32xf32>
      %200 = vector.broadcast %197 : vector<8x1xf32> to vector<8x32xf32>
      %201 = arith.mulf %199, %200 : vector<8x32xf32>
      %202 = vector.broadcast %182 : vector<1x32xf32> to vector<8x32xf32>
      %203 = arith.addf %201, %202 : vector<8x32xf32>
      %c0_92 = arith.constant 0 : index
      %c0_93 = arith.constant 0 : index
      %c0_94 = arith.constant 0 : index
      %204 = vector.load %arg18[%c0_92, %c0_93, %c0_94] : memref<1x8x32xf32, #tpu.memory_space<vmem>>, vector<1x8x32xf32>
      %205 = vector.shape_cast %204 : vector<1x8x32xf32> to vector<8x32xf32>
      %206 = vector.shape_cast %203 : vector<8x32xf32> to vector<1x8x32xf32>
      tpu.vector_store %arg18[%c0_92, %c0_93, %c0_94], %206 {strides = array<i32>} : memref<1x8x32xf32, #tpu.memory_space<vmem>>, vector<1x8x32xf32>,
    } else {
    }
    return
  }
  func.func @transform_0(%arg0: i32, %arg1: i32) -> (i32, i32, i32) {
    %c0_i32 = arith.constant 0 : i32
    %c0_i32_0 = arith.constant 0 : i32
    %c0_i32_1 = arith.constant 0 : i32
    return %arg0, %c0_i32, %c0_i32_0 : i32, i32, i32
  }
  func.func @transform_1(%arg0: i32, %arg1: i32) -> (i32, i32, i32) {
    %c0_i32 = arith.constant 0 : i32
    %c0_i32_0 = arith.constant 0 : i32
    %c0_i32_1 = arith.constant 0 : i32
    return %arg0, %c0_i32, %c0_i32_0 : i32, i32, i32
  }
  func.func @transform_2(%arg0: i32, %arg1: i32) -> (i32, i32, i32) {
    %c0_i32 = arith.constant 0 : i32
    %c0_i32_0 = arith.constant 0 : i32
    %c0_i32_1 = arith.constant 0 : i32
    return %arg1, %c0_i32, %c0_i32_0 : i32, i32, i32
  }
  func.func @transform_3(%arg0: i32, %arg1: i32) -> (i32, i32, i32) {
    %c0_i32 = arith.constant 0 : i32
    %c0_i32_0 = arith.constant 0 : i32
    %c0_i32_1 = arith.constant 0 : i32
    return %arg1, %c0_i32, %c0_i32_0 : i32, i32, i32
  }
  func.func @transform_4(%arg0: i32, %arg1: i32) -> (i32, i32, i32) {
    %c0_i32 = arith.constant 0 : i32
    %c0_i32_0 = arith.constant 0 : i32
    %c0_i32_1 = arith.constant 0 : i32
    return %arg1, %c0_i32, %c0_i32_0 : i32, i32, i32
  }
  func.func @transform_5(%arg0: i32, %arg1: i32) -> (i32, i32, i32) {
    %c0_i32 = arith.constant 0 : i32
    %c0_i32_0 = arith.constant 0 : i32
    %c0_i32_1 = arith.constant 0 : i32
    return %arg1, %c0_i32, %c0_i32_0 : i32, i32, i32
  }
  func.func @transform_6(%arg0: i32, %arg1: i32) -> (i32, i32, i32) {
    %c0_i32 = arith.constant 0 : i32
    %c0_i32_0 = arith.constant 0 : i32
    %c0_i32_1 = arith.constant 0 : i32
    return %arg1, %c0_i32, %c0_i32_0 : i32, i32, i32
  }
  func.func @transform_7(%arg0: i32, %arg1: i32) -> (i32, i32, i32) {
    %c0_i32 = arith.constant 0 : i32
    %c0_i32_0 = arith.constant 0 : i32
    %c0_i32_1 = arith.constant 0 : i32
    return %arg1, %c0_i32, %c0_i32_0 : i32, i32, i32
  }
  func.func @transform_8(%arg0: i32, %arg1: i32) -> (i32, i32, i32) {
    %c0_i32 = arith.constant 0 : i32
    %c0_i32_0 = arith.constant 0 : i32
    %c0_i32_1 = arith.constant 0 : i32
    return %arg1, %c0_i32, %c0_i32_0 : i32, i32, i32
  }
  func.func @transform_9(%arg0: i32, %arg1: i32) -> (i32, i32, i32) {
    %c0_i32 = arith.constant 0 : i32
    %c0_i32_0 = arith.constant 0 : i32
    %c0_i32_1 = arith.constant 0 : i32
    return %arg1, %c0_i32, %c0_i32_0 : i32, i32, i32
  }
  func.func @transform_10(%arg0: i32, %arg1: i32) -> (i32, i32, i32) {
    %c0_i32 = arith.constant 0 : i32
    %c0_i32_0 = arith.constant 0 : i32
    %c0_i32_1 = arith.constant 0 : i32
    return %arg1, %c0_i32, %c0_i32_0 : i32, i32, i32
  }
  func.func @transform_11(%arg0: i32, %arg1: i32) -> (i32, i32, i32) {
    %c0_i32 = arith.constant 0 : i32
    %c0_i32_0 = arith.constant 0 : i32
    %c0_i32_1 = arith.constant 0 : i32
    return %arg1, %c0_i32, %c0_i32_0 : i32, i32, i32
  }
  func.func @transform_12(%arg0: i32, %arg1: i32) -> (i32, i32, i32) {
    %c0_i32 = arith.constant 0 : i32
    %c0_i32_0 = arith.constant 0 : i32
    %c0_i32_1 = arith.constant 0 : i32
    return %arg1, %c0_i32, %c0_i32_0 : i32, i32, i32
  }
  func.func @transform_13(%arg0: i32, %arg1: i32) -> (i32, i32, i32) {
    %c0_i32 = arith.constant 0 : i32
    %c0_i32_0 = arith.constant 0 : i32
    %c0_i32_1 = arith.constant 0 : i32
    return %arg1, %c0_i32, %c0_i32_0 : i32, i32, i32
  }
  func.func @transform_14(%arg0: i32, %arg1: i32) -> (i32, i32) {
    %c0_i32 = arith.constant 0 : i32
    %c0_i32_0 = arith.constant 0 : i32
    %c0_i32_1 = arith.constant 0 : i32
    return %c0_i32, %c0_i32_0 : i32, i32
  }
  func.func @transform_15(%arg0: i32, %arg1: i32) -> (i32, i32) {
    %c0_i32 = arith.constant 0 : i32
    %c0_i32_0 = arith.constant 0 : i32
    %c0_i32_1 = arith.constant 0 : i32
    return %c0_i32, %c0_i32_0 : i32, i32
  }
  func.func @transform_16(%arg0: i32, %arg1: i32) -> (i32, i32, i32) {
    %c0_i32 = arith.constant 0 : i32
    %c0_i32_0 = arith.constant 0 : i32
    %c0_i32_1 = arith.constant 0 : i32
    return %arg0, %c0_i32, %c0_i32_0 : i32, i32, i32
  }
}

</mosaic_0001>

<bundles_post_ra>
// kernel: tpu_custom_call.1
= control target key start
LH: loop header
LB: loop body
LE: loop exit
PB: predicated region body
PF: predicated region fallthrough
CT: control target
= control target key end

     0   :  { %s2852_s0 = inlined_call_operand.hbm [shape: f32[2,8,32], index: 0, kind: input, shape index: {}]   ;;  %s2853_s1 = inlined_call_operand.hbm [shape: f32[2,1,8], index: 1, kind: input, shape index: {}]   ;;  %s2854_s2 = inlined_call_operand.vmem [shape: f32[2,32,96], index: 2, kind: input, shape index: {}]   ;;  %s2855_s3 = inlined_call_operand.vmem [shape: f32[2,1,96], index: 3, kind: input, shape index: {}]   ;;  %s2856_s4 = inlined_call_operand.vmem [shape: f32[2,32,32], index: 4, kind: input, shape index: {}]   ;;  %s2857_s5 = inlined_call_operand.hbm [shape: f32[2,1,32], index: 5, kind: input, shape index: {}]   ;;  %s2858_s6 = inlined_call_operand.vmem [shape: f32[2,32,64], index: 6, kind: input, shape index: {}]   ;;  %s2859_s7 = inlined_call_operand.vmem [shape: f32[2,1,64], index: 7, kind: input, shape index: {}]   ;;  %s2860_s8 = inlined_call_operand.vmem [shape: f32[2,64,32], index: 8, kind: input, shape index: {}]   ;;  %s2861_s9 = inlined_call_operand.vmem [shape: f32[2,1,32], index: 9, kind: input, shape index: {}]   ;;  %s2862_s10 = inlined_call_operand.vmem [shape: f32[2,1,32], index: 10, kind: input, shape index: {}]   ;;  %s2863_s11 = inlined_call_operand.hbm [shape: f32[2,1,32], index: 11, kind: input, shape index: {}]   ;;  %s2864_s12 = inlined_call_operand.vmem [shape: f32[2,1,32], index: 12, kind: input, shape index: {}]   ;;  %s2865_s13 = inlined_call_operand.hbm [shape: f32[2,1,32], index: 13, kind: input, shape index: {}]   ;;  %s2866_s14 = inlined_call_operand.vmem [shape: f32[1,32], index: 14, kind: input, shape index: {}]   ;;  %s2867_s15 = inlined_call_operand.vmem [shape: f32[1,32], index: 15, kind: input, shape index: {}]   ;;  %s2868_s16 = inlined_call_operand.hbm [shape: f32[2,8,32], index: 16, kind: output, shape index: {}]  }
   0x1   :  { %2886 = sst [smem:[#allocation32_spill]] %s2852_s0 }
   0x2   :  { %2887 = sst [smem:[#allocation33_spill]] %s2853_s1 }
   0x3   :  { %2888 = sst [smem:[#allocation34_spill]] %s2854_s2 }
   0x4   :  { %2889 = sst [smem:[#allocation35_spill]] %s2855_s3 }
   0x5   :  { %2890 = sst [smem:[#allocation36_spill]] %s2856_s4 }
   0x6   :  { %2891 = sst [smem:[#allocation37_spill]] %s2857_s5 }
   0x7   :  { %2892 = sst [smem:[#allocation38_spill]] %s2858_s6 }
   0x8   :  { %2893 = sst [smem:[#allocation39_spill]] %s2859_s7 }
   0x9   :  { %2894 = sst [smem:[#allocation40_spill]] %s2860_s8 }
   0xa   :  { %2895 = sst [smem:[#allocation41_spill]] %s2861_s9 }
   0xb   :  { %2896 = sst [smem:[#allocation42_spill]] %s2862_s10 }
   0xc   :  { %2897 = sst [smem:[#allocation43_spill]] %s2863_s11 }
   0xd   :  { %2898 = sst [smem:[#allocation44_spill]] %s2864_s12 }
   0xe   :  { %2899 = sst [smem:[#allocation45_spill]] %s2865_s13 }
   0xf   :  { %2900 = sst [smem:[#allocation46_spill]] %s2866_s14 }
  0x10   :  { %2901 = sst [smem:[#allocation47_spill]] %s2867_s15 }
  0x11   :  { %2902 = sst [smem:[#allocation48_spill]] %s2868_s16 }
  0x12   :  { %21 = vsyncpa [#allocation4], 0 }
  0x13   :  { %23 = vsyncpa [#allocation4 + $0x1], 0 }
  0x14   :  { %24 = vsyncpa [#allocation7], 0 }
  0x15   :  { %26 = vsyncpa [#allocation7 + $0x1], 0 }
  0x16   :  { %27 = vsyncpa [#allocation10], 0 }
  0x17   :  { %29 = vsyncpa [#allocation10 + $0x1], 0 }
  0x18   :  { %30 = vsyncpa [#allocation5], 0 }
  0x19   :  { %32 = vsyncpa [#allocation5 + $0x1], 0  ;;  %s2387_s21 = smov 0   ;;  %s2389_s22 = smov 0  }
  0x1a   :  { %s2391_s23 = smov 0   ;;  %s2393_s24 = smov 0  }
  0x1b   :  { %s2395_s25 = smov 0   ;;  %s2397_s26 = smov 0  }
  0x1c   :  { %s2399_s27 = smov 0   ;;  %s2401_s28 = smov 0  }
  0x1d   :  { %s2403_s29 = smov 0   ;;  %s2405_s30 = smov 0  }
  0x1e   :  { %s2407_s0 = smov 0  }
  0x1f LB: > { %2903 = sst [smem:[#allocation18_spill]] %s2256_s23  ;;  %s2443_s17 = sadd.s32 4294967295, %s2288_s0   ;;  %s2288_s0 = sphi %s2407_s0, %s38_s0   ;;  %s2284_s30 = sphi %s2405_s30, %s2972_s30   ;;  %s2280_s29 = sphi %s2403_s29, %s2971_s29   ;;  %s2276_s28 = sphi %s2401_s28, %s2970_s28   ;;  %s2272_s27 = sphi %s2399_s27, %s2969_s27   ;;  %s2268_s26 = sphi %s2397_s26, %s2968_s26   ;;  %s2264_s25 = sphi %s2395_s25, %s2976_s25   ;;  %s2260_s24 = sphi %s2393_s24, %s2975_s24   ;;  %s2256_s23 = sphi %s2391_s23, %s2966_s23   ;;  %s2252_s22 = sphi %s2389_s22, %s2974_s22   ;;  %s2248_s21 = sphi %s2387_s21, %s2973_s21  }
  0x20   : > { %2904 = sst [smem:[#allocation19_spill]] %s2260_s24  ;;  %s1784_s18 = sadd.s32 4294967294, %s2288_s0  }
  0x21   : > { %2905 = sst [smem:[#allocation20_spill]] %s2268_s26  ;;  %p64_p0 = scmp.ne.s32.totalorder %s2268_s26, %s2264_s25 }
  0x22   : > { %2906 = sst [smem:[#allocation21_spill]] %s2272_s27  ;;  %p65_p1 = scmp.eq.s32.totalorder %s2288_s0, 0 }
  0x23   : > { %2907 = sst [smem:[#allocation22_spill]] %s2276_s28  ;;  %p70_p2 = scmp.ne.s32.totalorder %s2264_s25, %s2260_s24 }
  0x24   : > { %2908 = sst [smem:[#allocation23_spill]] %s2280_s29  ;;  %p71_p3 = scmp.eq.s32.totalorder %s2443_s17, 0 }
  0x25   : > { %2909 = sst [smem:[#allocation24_spill]] %s2284_s30  ;;  %p66_p4 = por %p65_p1, %p64_p0 }
  0x26   : > { %2910 = sst [smem:[#allocation25_spill]] %s2288_s0  ;;  %p474_p5 = scmp.eq.s32.totalorder %s2443_s17, 3 }
  0x27   : > { %p2459_p6 = por %p71_p3, %p70_p2  ;;  %p480_p7 = scmp.eq.s32.totalorder %s1784_s18, 3 }
  0x28   : > { %p2463_p8 = por %p474_p5, %p64_p0  ;;  %p2874_p10 = scmp.lt.s32.totalorder %s2288_s0, 4 }
  0x29   : > { %p2467_p9 = por %p480_p7, %p70_p2  ;;  %s2473_s24 = sand.u32 1, %s2268_s26  }
  0x2a   : > { %s2912_s19 = scalar_select %p2463_p8, 1, 0 }
  0x2b   : > { %s2914_s20 = scalar_select %p2467_p9, 1, 0 }
  0x2c   : > { %2913 = sst [smem:[#allocation26_spill]] %s2912_s19  ;;  %p2478_p11 = pnand %p2874_p10, %p66_p4 }
  0x2d   : > { %2915 = sst [smem:[#allocation27_spill]] %s2914_s20  ;;  %s528_s28 = scalar_lea.vmem [#allocation6], %s2473_s24 }
  0x2e   : > { %s2917_s1 = sld [smem:[#allocation33_spill]]  ;;  %s535_s12 = sshll.u32 %s528_s28, 4  ;;  %s536_s12 = int_to_ptr.vmem [resolvable:$true] %s535_s12 }
  0x2f   : > { %p1789_p12 = scmp.ge.s32.totalorder %s2288_s0, 1  ;;  %s2918_s10 = sand.u32 1, %s2288_s0  }
  0x30   : > { %s2490_s8 = scalar_lea.sflag [#allocation7], %s2918_s10  ;;  %p653_p13 = scmp.lt.s32.totalorder %s2288_s0, 5 }
  0x31   : > { %s47_s19 = sadd.s32 1, %s2280_s29  ;;  %s187_s28 = sadd.s32 1, %s2256_s23 }
  0x32   : > { %p2496_p0 = pnand %p1789_p12, %p653_p13  ;;  %p48_p2 = scmp.ge.s32.totalorder %s47_s19, 2 }
  0x33   : > { %p194_p4 = scmp.ne.s32.totalorder %s2256_s23, %s2252_s22  ;;  %p200_p5 = scmp.ne.s32.totalorder %s2252_s22, %s2248_s21 }
  0x34   : > { %s531_s20 = scalar_lea.hbm %s2917_s1, %s2284_s30  ;;  %s2507_s10 = sand.u32 1, %s2256_s23  }
  0x35   : > { %s533_s14 = sshll.u32 %s531_s20, 4  ;;  %s2978_s19 = smov (%p48_p2, %s47_s19), 0  ;;  %s534_s14 = int_to_ptr.hbm [resolvable:$true] %s533_s14 }
  0x36   : > { %1847 = dma.hbm_to_vmem [thread:$0]  (!%p2478_p11), %s534_s14, 16, %s536_s12, %s2490_s8  }
  0x37   : > { %2920 = sst [smem:[#allocation28_spill]] %s2978_s19  ;;  %s2921_s12 = sadd.s32 1, %s2284_s30 }
  0x38   : > { %s2980_s12 = smov (!%p48_p2, %s2921_s12), %s2284_s30  ;;  %s184_s14 = ssub.s32 %s2280_s29, %s2978_s19 }
  0x39   : > { %p196_p7 = por %p194_p4, %p65_p1  ;;  %p52_p12 = scmp.ge.s32.totalorder %s2980_s12, 2 }
  0x3a   : > { %p185_p13 = scmp.eq.s32.totalorder %s184_s14, 0  ;;  %p2520_p10 = por %p200_p5, %p71_p3 }
  0x3b   : > { %p2923_p9 = scmp.lt.s32.totalorder %s2288_s0, 4  ;;  %s2982_s12 = smov (%p52_p12, %s2980_s12), 0 }
  0x3c   : > { %2925 = sst [smem:[#allocation29_spill]] %s2982_s12  ;;  %s54_s19 = ssub.s32 %s2284_s30, %s2982_s12 }
  0x3d   : > { %p2526_p8 = pnand %p2923_p9, %p196_p7  ;;  %p55_p1 = scmp.eq.s32.totalorder %s54_s19, 0 }
  0x3e   : > { %s2533_s1 = scalar_select %p185_p13, %s2256_s23, %s187_s28  }
  0x3f   : > { %s2927_s11 = sld [smem:[#allocation43_spill]]  ;;  %s2928_s6 = sadd.s32 1, %s2268_s26 }
  0x40   : > { %2926 = sst [smem:[#allocation30_spill]] %s2533_s1  ;;  %s618_s3 = scalar_lea.vmem [#allocation9], %s2507_s10 }
  0x41   : > { %s2544_s4 = scalar_select %p55_p1, %s2268_s26, %s2928_s6  }
  0x42   : > { %s625_s27 = sshll.u32 %s618_s3, 4  ;;  %s2930_s28 = sand.u32 1, %s2288_s0   ;;  %s626_s27 = int_to_ptr.vmem [resolvable:$true] %s625_s27 }
  0x43   : > { %2929 = sst [smem:[#allocation31_spill]] %s2544_s4  ;;  %s616_s1 = scalar_lea.sflag [#allocation10], %s2930_s28 }
  0x44   : > { %s1787_s19 = sshll.u32 %s2473_s24, 3  ;;  %s1788_s9 = sshll.u32 %s2284_s30, 3 }
  0x45   : > { %s621_s7 = scalar_lea.hbm %s2927_s11, %s2280_s29  ;;  %s2931_s11 = sld [smem:[#allocation32_spill]] }
  0x46   : > { %s623_s2 = sshll.u32 %s621_s7, 4  ;;  %s510_s12 = scalar_lea.vmem [#allocation3], %s1787_s19  ;;  %s624_s2 = int_to_ptr.hbm [resolvable:$true] %s623_s2 }
  0x47   : > { %1853 = dma.hbm_to_vmem [thread:$0]  (!%p2526_p8), %s624_s2, 16, %s626_s27, %s616_s1  }
  0x48   : > { %s518_s4 = sshll.u32 %s510_s12, 4  ;;  %s507_s26 = scalar_lea.sflag [#allocation4], %s2473_s24  ;;  %s519_s4 = int_to_ptr.vmem [resolvable:$true] %s518_s4 }
  0x49   : > { %s2932_s5 = sld [smem:[#allocation37_spill]]  ;;  %s567_s30 = scalar_lea.vmem [#allocation8], %s2507_s10 }
  0x4a   : > { %s574_s23 = sshll.u32 %s567_s30, 4  ;;  %s2933_s13 = sld [smem:[#allocation45_spill]]  ;;  %s575_s23 = int_to_ptr.vmem [resolvable:$true] %s574_s23 }
  0x4b   : > { %s514_s7 = scalar_lea.hbm %s2931_s11, %s1788_s9  ;;  %s641_s9 = scalar_lea.vmem [#allocation11], %s2507_s10 }
  0x4c   : > { %s516_s3 = sshll.u32 %s514_s7, 4  ;;  %s648_s14 = sshll.u32 %s641_s9, 4  ;;  %s517_s3 = int_to_ptr.hbm [resolvable:$true] %s516_s3  ;;  %s649_s14 = int_to_ptr.vmem [resolvable:$true] %s648_s14 }
  0x4d   : > { %1844 = dma.hbm_to_vmem [thread:$0]  (!%p2478_p11), %s517_s3, 128, %s519_s4, %s507_s26  }
  0x4e   : > { %s2577_s4 = sand.u32 (!%p2496_p0), 1, %s2264_s25  }
  0x4f   : > { %s570_s28 = scalar_lea.hbm %s2932_s5, %s2280_s29  ;;  %657 = sbr.rel (%p2496_p0) target bundleno = 2727 (0xaa7), region = 84 }
  0x50   : > { %s572_s0 = sshll.u32 %s570_s28, 4  ;;  %s644_s19 = scalar_lea.hbm %s2933_s13, %s2280_s29  ;;  %s573_s0 = int_to_ptr.hbm [resolvable:$true] %s572_s0 }
  0x51   : > { %1850 = dma.hbm_to_vmem [thread:$0]  (!%p2526_p8), %s573_s0, 16, %s575_s23, %s2490_s8  }
  0x52   : > { %s646_s24 = sshll.u32 %s644_s19, 4  ;;  %s2884_s8 = sshll.u32 (!%p2496_p0), %s2577_s4, 3  ;;  %s647_s24 = int_to_ptr.hbm [resolvable:$true] %s646_s24 }
  0x53   : > { %1856 = dma.hbm_to_vmem [thread:$0]  (!%p2526_p8), %s647_s24, 16, %s649_s14, %s616_s1  }
  0x54   : > { %s660_s23 = scalar_lea.sflag [#allocation4], %s2577_s4  ;;  %s2583_s26 = scalar_lea.vmem [#allocation3], %s2884_s8 }
  0x55   : > { %2227 = dma.done.wait (%p2459_p6), %s660_s23, 128  }
  0x56   : > { %2229 = vsyncadd (%p2459_p6), %s660_s23, 4294967168  ;;  %s669_s1 = sand.u32 1, %s2443_s17  }
  0x57   : > { %s670_s30 = scalar_lea.sflag [#allocation7], %s669_s1 }
  0x58   : > { %2231 = dma.done.wait (%p2459_p6), %s670_s30, 16  }
  0x59   : > { %2233 = vsyncadd (%p2459_p6), %s670_s30, 4294967280  ;;  %s2596_s18 = sand.u32 1, %s2252_s22  }
  0x5a   : > { %2235 = dma.done.wait (%p2520_p10), %s670_s30, 16  }
  0x5b   : > { %2237 = vsyncadd (%p2520_p10), %s670_s30, 4294967280  ;;  %s688_s17 = scalar_lea.sflag [#allocation10], %s669_s1 }
  0x5c   : > { %2239 = dma.done.wait (%p2520_p10), %s688_s17, 32  }
  0x5d   : > { %2241 = vsyncadd (%p2520_p10), %s688_s17, 4294967264  ;;  %s2934_s16 = sld [smem:[#allocation21_spill]]  ;;  %s699_s0 = scalar_lea.vmem [#allocation11], %s2596_s18 }
  0x5e   : > { %s2936_s11 = sld [smem:[#allocation34_spill]]  ;;  %s2944_s15 = sshll.u32 %s2577_s4, 3 }
  0x5f   : > { %s2937_s14 = sld [smem:[#allocation36_spill]] }
  0x60   : > { %s2938_s30 = sld [smem:[#allocation38_spill]] }
  0x61   : > { %s2939_s10 = sld [smem:[#allocation39_spill]] }
  0x62   : > { %s2940_s27 = sld [smem:[#allocation41_spill]] }
  0x63   : > { %p800_p3 = scmp.lt.s32.totalorder %s2934_s16, 1  ;;  %s2941_s5 = sld [smem:[#allocation40_spill]] }
  0x64   : > { %s2942_s13 = sld [smem:[#allocation42_spill]]  ;;  %p1800_p6 = scmp.ne.s32.totalorder %s2934_s16, 0 }
  0x65   : > { %s2610_s21 = scalar_select %p800_p3, %s2934_s16, 1 }
  0x67   : > { %s1825_s6 = sshll.u32 %s2610_s21, 5  ;;  %s820_s7 = scalar_lea.vmem %s2939_s10, %s2610_s21 }
  0x68   : > { %s2620_s12 = scalar_lea.vmem %s2936_s11, %s1825_s6  ;;  %s2625_s24 = scalar_lea.vmem %s2937_s14, %s1825_s6 }
  0x69   : > { %s2630_s17 = scalar_lea.vmem %s2938_s30, %s1825_s6  ;;  %s1828_s3 = sshll.u32 %s2610_s21, 6 }
  0x6a   : > { %s828_s28 = scalar_lea.vmem %s2940_s27, %s2610_s21  ;;  %s2644_s19 = scalar_lea.vmem %s2941_s5, %s1828_s3 }
  0x6b   : > { %s831_s23 = scalar_lea.vmem %s2942_s13, %s2610_s21  ;;  %s2943_s30 = sld [smem:[#allocation44_spill]] }
  0x6c   : > { %s2657_s10 = scalar_lea.vmem [#allocation12], %s2944_s15 }
  0x6d   : > { %838 = sbr.rel (%p1800_p6) target bundleno = 116 (0x74), region = 108 }
  0x71   : > { %s834_s29 = scalar_lea.vmem %s2943_s30, %s2610_s21 }
  0x72   : > { %v839_v0 = vld [vmem:[%s2583_s26] sm:$0xff]  ;;  %vm840_vm0 = vcmask 261120  }
  0x73   : > { %841 = vst.msk [vmem:[#allocation2] sm:$0xff] %vm840_vm0, %v839_v0 }
  0x74 PF: > { %vm846_vm1 = vcmask 261120   ;;  %v2290_v3 = vmov 32.0   ;;  %v903_v15 = vld [vmem:[%s2620_s12 + $0x18] sm:$0xff]  ;;  %v902_v16 = vld [vmem:[%s2620_s12 + $0x10] sm:$0xff]  ;;  %v901_v17 = vld [vmem:[%s2620_s12 + $0x8] sm:$0xff]  ;;  %s2946_s26 = scalar_lea.vmem [#allocation9], %s2596_s18 }
  0x75   : > { %1972 = vrcp.f32 %v2290_v3  ;;  %923 = vmatpush.msra.mxu0 %v903_v15  ;;  %v900_v18 = vld [vmem:[%s2620_s12] sm:$0xff]  ;;  %s2947_s12 = sld [smem:[#allocation35_spill]]  ;;  %s2291_s2 = smov 88   ;;  %vm942_vm9 = vcmask 64512  }
  0x76   : > { %v1963_v36 = vld [vmem:[%s831_s23] ss:$0 sm:$0xff]  ;;  %s2292_s27 = smov 96   ;;  %s2293_s11 = smov 72  }
  0x77   : > { %924 = vmatpush.msra.mxu0 %v902_v16  ;;  %v1964_v43 = vld [vmem:[%s2946_s26] ss:$0 sm:$0xff]  ;;  %s2294_s9 = smov 80   ;;  %s2949_s14 = scalar_lea.vmem [#allocation6], %s2577_s4 }
  0x78   : > { %v932_v50 = vld [vmem:[%s2625_s24] sm:$0xff]  ;;  %s2295_s23 = smov 64   ;;  %s2296_s6 = smov 120  }
  0x79   : > { %925 = vmatpush.msra.mxu0 %v901_v17  ;;  %1137 = vmatpush.msra.mxu3 %v932_v50  ;;  %v2702_v56 = vld [vmem:[%s2949_s14] ss:$0 sm:$0xff]  ;;  %s2297_s1 = smov 104   ;;  %s2298_s30 = smov 112  }
  0x7a   : > { %v2661_v1 = vld [vmem:[#allocation2] sm:$0xff]  ;;  %s2299_s15 = smov 48   ;;  %s2300_s5 = smov 40  }
  0x7b   : > { %v847_v2 = vsel %vm846_vm1, %v2661_v1, 0.0  ;;  %v1973_v4 = vpop.eup %1972  ;;  %926 = vmatpush.msra.mxu0 %v900_v18  ;;  %s2948_s3 = scalar_lea.vmem %s2947_s12, %s2610_s21  ;;  %s2301_s13 = smov 56  }
  0x7c   : > { %848 = vadd.xlane.f32.xlu0 %v847_v2  ;;  %v851_v5 = vmul.f32 32.0, %v1973_v4  ;;  %vm855_vm2 = vweird.f32 %v1973_v4  ;;  %v1965_v47 = vld [vmem:[%s2948_s3] ss:$0 sm:$0xff] }
  0x7e   : > { %v852_v6 = vsub.f32 1.0, %v851_v5 }
  0x80   : > { %v853_v7 = vmul.f32 %v1973_v4, %v852_v6 }
  0x82   : > { %v854_v8 = vadd.f32 %v1973_v4, %v853_v7 }
  0x84   : > { %v2665_v9 = vsel %vm855_vm2, %v1973_v4, %v854_v8 }
  0xef   : > { %v849_v10 = vpop.xlane.xlu0 %848 }
  0xf0   : > { %v857_v11 = vmul.f32 %v2665_v9, %v849_v10 }
  0xf2   : > { %v858_v12 = vsub.f32 %v2661_v1, %v857_v11 }
  0xf4   : > { %v859_v13 = vmul.f32 %v858_v12, %v858_v12  ;;  %v894_v41 = vmul.f32 %v1963_v36, %v858_v12 }
  0xf6   : > { %v860_v14 = vsel %vm846_vm1, %v859_v13, 0.0 }
  0xf7   : > { %861 = vadd.xlane.f32.xlu0 %v860_v14 }
 0x16a   : > { %v862_v19 = vpop.xlane.xlu0 %861 }
 0x16b   : > { %v863_v20 = vmul.f32 0.032258064, %v862_v19 }
 0x16d   : > { %1974 = vrsqrt.f32 %v863_v20  ;;  %vm871_vm3 = vcmp.eq.f32.partialorder %v863_v20, inf  ;;  %v874_v28 = vand.u32 2147483648, %v863_v20  ;;  %vm873_vm4 = vcmp.eq.f32.partialorder %v863_v20, 0.0 }
 0x173   : > { %v1975_v21 = vpop.eup %1974 }
 0x174   : > { %v865_v22 = vmul.f32 %v1975_v21, %v863_v20 }
 0x176   : > { %v866_v23 = vmul.f32 %v1975_v21, %v865_v22 }
 0x178   : > { %v867_v24 = vmul.f32 0.5, %v866_v23 }
 0x17a   : > { %v868_v25 = vsub.f32 1.5, %v867_v24 }
 0x17c   : > { %v869_v26 = vmul.f32 %v1975_v21, %v868_v25 }
 0x17e   : > { %v870_v27 = vmul.f32 %v869_v26, %v863_v20 }
 0x180   : > { %v872_v29 = vsel %vm871_vm3, %v863_v20, %v870_v27 }
 0x181   : > { %v875_v30 = vsel %vm873_vm4, %v874_v28, %v872_v29 }
 0x182   : > { %v876_v31 = vadd.f32 1e-06, %v875_v30 }
 0x184   : > { %1976 = vrcp.f32 %v876_v31  ;;  %v888_v35 = vand.u32 2147483648, %v876_v31  ;;  %v886_v38 = vand.u32 2147483647, %v876_v31  ;;  %vm882_vm6 = vweird.f32 %v876_v31 }
 0x186   : > { %v889_v40 = vor.u32 1.1754944e-38, %v888_v35  ;;  %vm887_vm8 = vcmp.eq.f32.partialorder %v886_v38, 8.507059e+37 }
 0x18a   : > { %v1977_v32 = vpop.eup %1976 }
 0x18b   : > { %v878_v33 = vmul.f32 %v1977_v32, %v876_v31  ;;  %vm883_vm5 = vweird.f32 %v1977_v32 }
 0x18c   : > { %vm884_vm7 = vmor %vm882_vm6, %vm883_vm5 }
 0x18d   : > { %v879_v34 = vsub.f32 1.0, %v878_v33 }
 0x18f   : > { %v880_v37 = vmul.f32 %v1977_v32, %v879_v34 }
 0x191   : > { %v881_v39 = vadd.f32 %v1977_v32, %v880_v37 }
 0x193   : > { %v885_v42 = vsel %vm884_vm7, %v1977_v32, %v881_v39 }
 0x194   : > { %v890_v44 = vsel %vm887_vm8, %v889_v40, %v885_v42 }
 0x195   : > { %v895_v45 = vmul.f32 %v894_v41, %v890_v44 }
 0x197   : > { %v899_v46 = vadd.f32 %v1964_v43, %v895_v45 }
 0x199   : > { %1801 = vmatmul.msk.f32.vlgmr.msra.gmra.mxu0 %vm846_vm1, %v899_v46 }
 0x216   : > { %v928_v48 = vpop.f32.mrf.mxu0 }
 0x217   : > { %v2687_v49 = vadd.f32 %v1965_v47, %v928_v48 }
 0x219   : > { %1020 = vrot.lane.b32.xlu0 %v2687_v49, %s2291_s2  ;;  %940 = vrot.lane.b32.xlu1 %v2687_v49, %s2292_s27  ;;  %v931_v53 = vmul.f32 0.35355338, %v2687_v49 }
 0x221   : > { %1246 = vrot.lane.b32.xlu0 %v2687_v49, %s2293_s11 }
 0x229   : > { %1144 = vrot.lane.b32.xlu0 %v2687_v49, %s2294_s9 }
 0x28b   : > { %v1021_v51 = vpop.permute.xlu0 %1020  ;;  %v941_v52 = vpop.permute.xlu1 %940 }
 0x28c   : > { %1802 = vmatpush.xpose.msk.msra.mxu1 %vm942_vm9, %v941_v52  ;;  %1805 = vmatpush.xpose.msk.msrb.mxu0 %vm942_vm9, %v1021_v51 }
 0x28f   : > { %1803 = vmatmul.msk.f32.vlgmr.msra.gmra.mxu1 %vm942_vm9, %v931_v53 }
 0x293   : > { %v1247_v54 = vpop.permute.xlu0 %1246 }
 0x294   : > { %1814 = vmatpush.xpose.msk.msrb.mxu3 %vm942_vm9, %v1247_v54 }
 0x29b   : > { %v1145_v55 = vpop.permute.xlu0 %1144 }
 0x29c   : > { %1810 = vmatpush.xpose.msk.msra.mxu0 %vm942_vm9, %v1145_v55 }
 0x30c   : > { %v965_v57 = vpop.f32.mrf.mxu1 }
 0x30d   : > { %v966_v58 = vadd.f32 %v2702_v56, %v965_v57 }
 0x30f   : > { %v968_v59 = vsel %vm942_vm9, %v966_v58, -inf }
 0x310   : > { %969 = vmax.xlane.f32.xlu1 %v968_v59 }
 0x383   : > { %v970_v60 = vpop.xlane.xlu1 %969 }
 0x384   : > { %v971_v61 = vsub.f32 %v966_v58, %v970_v60 }
 0x386   : > { %v972_v62 = vmul.f32 1.442695, %v971_v61 }
 0x388   : > { %1978 = vpow2.f32 %v972_v62 }
 0x38e   : > { %v1979_v63 = vpop.eup %1978 }
 0x38f   : > { %v974_v0 = vsel %vm942_vm9, %v1979_v63, 0.0 }
 0x390   : > { %975 = vadd.xlane.f32.xlu2 %v974_v0 }
 0x3a8   : > { %992 = vrot.lane.b32.xlu2 %v2687_v49, %s2295_s23 }
 0x3b0   : > { %1018 = vrot.lane.b32.xlu2 %v931_v53, %s2296_s6 }
 0x3b8   : > { %1244 = vrot.lane.b32.xlu2 %v931_v53, %s2297_s1 }
 0x3c0   : > { %1142 = vrot.lane.b32.xlu2 %v931_v53, %s2298_s30 }
 0x403   : > { %v976_v2 = vpop.xlane.xlu2 %975 }
 0x404   : > { %1980 = vrcp.f32 %v976_v2  ;;  %v988_v7 = vand.u32 2147483648, %v976_v2  ;;  %v986_v10 = vand.u32 2147483647, %v976_v2  ;;  %vm982_vm11 = vweird.f32 %v976_v2 }
 0x406   : > { %v989_v12 = vor.u32 1.1754944e-38, %v988_v7  ;;  %vm987_vm13 = vcmp.eq.f32.partialorder %v986_v10, 8.507059e+37 }
 0x40a   : > { %v1981_v3 = vpop.eup %1980 }
 0x40b   : > { %v978_v4 = vmul.f32 %v1981_v3, %v976_v2  ;;  %v993_v5 = vpop.permute.xlu2 %992  ;;  %vm983_vm10 = vweird.f32 %v1981_v3 }
 0x40c   : > { %1013 = vmatpush.msra.mxu2 %v993_v5  ;;  %vm984_vm12 = vmor %vm982_vm11, %vm983_vm10 }
 0x40d   : > { %v979_v6 = vsub.f32 1.0, %v978_v4 }
 0x40f   : > { %v980_v8 = vmul.f32 %v1981_v3, %v979_v6 }
 0x411   : > { %v981_v11 = vadd.f32 %v1981_v3, %v980_v8 }
 0x413   : > { %v1019_v13 = vpop.permute.xlu2 %1018  ;;  %v985_v14 = vsel %vm984_vm12, %v1981_v3, %v981_v11 }
 0x414   : > { %1806 = vmatmul.msk.f32.vlgmr.msrb.gmra.mxu0 %vm942_vm9, %v1019_v13  ;;  %v990_v15 = vsel %vm987_vm13, %v989_v12, %v985_v14 }
 0x415   : > { %v991_v16 = vmul.f32 %v1979_v63, %v990_v15 }
 0x417   : > { %1804 = vmatmul.msk.f32.vlgmr.msra.gmra.mxu2 %vm942_vm9, %v991_v16 }
 0x41b   : > { %v1245_v17 = vpop.permute.xlu2 %1244 }
 0x423   : > { %v1143_v18 = vpop.permute.xlu2 %1142 }
 0x424   : > { %1811 = vmatmul.msk.f32.vlgmr.msra.gmra.mxu0 %vm942_vm9, %v1143_v18 }
 0x491   : > { %v1043_v19 = vpop.f32.mrf.mxu0 }
 0x492   : > { %v1044_v20 = vadd.f32 %v2702_v56, %v1043_v19 }
 0x494   : > { %v1046_v21 = vsel %vm942_vm9, %v1044_v20, -inf }
 0x495   : > { %1047 = vmax.xlane.f32.xlu1 %v1046_v21 }
 0x49a   : > { %v1015_v22 = vpop.f32.mrf.mxu2 }
 0x49b   : > { %1809 = vmatmul.msk.f32.vlgmr.msra.gmra.mxu3 %vm942_vm9, %v1015_v22  ;;  %v935_v22 = vld [vmem:[%s2625_s24 + $0x18] sm:$0xff] }
 0x4a1   : > { %v1167_v23 = vpop.f32.mrf.mxu0 }
 0x4a2   : > { %v1168_v24 = vadd.f32 %v2702_v56, %v1167_v23  ;;  %v933_v23 = vld [vmem:[%s2625_s24 + $0x8] sm:$0xff] }
 0x4a3   : > { %1815 = vmatmul.msk.f32.vlgmr.msrb.gmra.mxu3 %vm942_vm9, %v1245_v17  ;;  %1114 = vmatpush.msrb.mxu1 %v933_v23 }
 0x4a4   : > { %v1170_v25 = vsel %vm942_vm9, %v1168_v24, -inf }
 0x4a5   : > { %1171 = vmax.xlane.f32.xlu0 %v1170_v25 }
 0x4b9   : > { %1194 = vrot.lane.b32.xlu0 %v2687_v49, %s2299_s15 }
 0x508   : > { %v1048_v26 = vpop.xlane.xlu1 %1047 }
 0x509   : > { %v1049_v27 = vsub.f32 %v1044_v20, %v1048_v26 }
 0x50b   : > { %v1050_v28 = vmul.f32 1.442695, %v1049_v27 }
 0x50d   : > { %1982 = vpow2.f32 %v1050_v28 }
 0x513   : > { %v2718_v29 = vpop.eup %1982 }
 0x514   : > { %v1052_v30 = vsel %vm942_vm9, %v2718_v29, 0.0 }
 0x515   : > { %1053 = vadd.xlane.f32.xlu1 %v1052_v30 }
 0x518   : > { %v1172_v31 = vpop.xlane.xlu0 %1171 }
 0x519   : > { %v1173_v32 = vsub.f32 %v1168_v24, %v1172_v31  ;;  %v934_v24 = vld [vmem:[%s2625_s24 + $0x10] sm:$0xff]  ;;  %s2950_s24 = scalar_lea.vmem [#allocation8], %s2596_s18 }
 0x51a   : > { %1238 = vmatpush.msra.mxu1 %v934_v24  ;;  %v1971_v24 = vld [vmem:[%s828_s28] ss:$0 sm:$0xff] }
 0x51b   : > { %v1174_v33 = vmul.f32 1.442695, %v1173_v32 }
 0x51d   : > { %1984 = vpow2.f32 %v1174_v33 }
 0x51e   : > { %v2722_v34 = vpop.f32.mrf.mxu3 }
 0x523   : > { %v2724_v35 = vpop.eup %1984 }
 0x524   : > { %v1176_v36 = vsel %vm942_vm9, %v2724_v35, 0.0 }
 0x525   : > { %1177 = vadd.xlane.f32.xlu1 %v1176_v36 }
 0x526   : > { %v1269_v37 = vpop.f32.mrf.mxu3 }
 0x527   : > { %v1270_v38 = vadd.f32 %v2702_v56, %v1269_v37 }
 0x529   : > { %v1272_v39 = vsel %vm942_vm9, %v1270_v38, -inf }
 0x52a   : > { %1273 = vmax.xlane.f32.xlu2 %v1272_v39 }
 0x52b   : > { %v1195_v17 = vpop.permute.xlu0 %1194 }
 0x542   : > { %1296 = vrot.lane.b32.xlu2 %v2687_v49, %s2300_s5 }
 0x588   : > { %v1054_v46 = vpop.xlane.xlu1 %1053 }
 0x589   : > { %v1066_v0 = vand.u32 2147483648, %v1054_v46  ;;  %vm1060_vm3 = vweird.f32 %v1054_v46  ;;  %v1064_v3 = vand.u32 2147483647, %v1054_v46 }
 0x58b   : > { %v1067_v10 = vor.u32 1.1754944e-38, %v1066_v0  ;;  %vm1065_vm6 = vcmp.eq.f32.partialorder %v1064_v3, 8.507059e+37 }
 0x598   : > { %v1178_v47 = vpop.xlane.xlu1 %1177 }
 0x599   : > { %v1190_v13 = vand.u32 2147483648, %v1178_v47  ;;  %vm1184_vm8 = vweird.f32 %v1178_v47  ;;  %v1188_v14 = vand.u32 2147483647, %v1178_v47 }
 0x59b   : > { %v1191_v19 = vor.u32 1.1754944e-38, %v1190_v13  ;;  %vm1189_vm11 = vcmp.eq.f32.partialorder %v1188_v14, 8.507059e+37  ;;  %v1969_v13 = vld [vmem:[%s699_s0] ss:$0 sm:$0xff] }
 0x59d   : > { %v1274_v40 = vpop.xlane.xlu2 %1273 }
 0x59e   : > { %v1275_v41 = vsub.f32 %v1270_v38, %v1274_v40 }
 0x5a0   : > { %v1276_v42 = vmul.f32 1.442695, %v1275_v41 }
 0x5a2   : > { %1986 = vpow2.f32 %v1276_v42 }
 0x5a3   : > { %1988 = vrcp.f32 %v1054_v46 }
 0x5a4   : > { %1990 = vrcp.f32 %v1178_v47 }
 0x5a5   : > { %v1297_v43 = vpop.permute.xlu2 %1296 }
 0x5a6   : > { %1317 = vmatpush.msrb.mxu0 %v1297_v43  ;;  %v1403_v43 = vld [vmem:[%s2630_s17 + $0x18] sm:$0xff] }
 0x5a8   : > { %v1987_v44 = vpop.eup %1986 }
 0x5a9   : > { %v1278_v45 = vsel %vm942_vm9, %v1987_v44, 0.0  ;;  %v1989_v48 = vpop.eup %1988 }
 0x5aa   : > { %1279 = vadd.xlane.f32.xlu1 %v1278_v45  ;;  %v1056_v51 = vmul.f32 %v1989_v48, %v1054_v46  ;;  %v1991_v52 = vpop.eup %1990  ;;  %vm1061_vm15 = vweird.f32 %v1989_v48  ;;  %v1400_v45 = vld [vmem:[%s2630_s17] sm:$0xff] }
 0x5ab   : > { %v1180_v57 = vmul.f32 %v1991_v52, %v1178_v47  ;;  %vm1062_vm5 = vmor %vm1060_vm3, %vm1061_vm15  ;;  %vm1185_vm7 = vweird.f32 %v1991_v52 }
 0x5ac   : > { %v1057_v53 = vsub.f32 1.0, %v1056_v51  ;;  %vm1186_vm10 = vmor %vm1184_vm8, %vm1185_vm7 }
 0x5ad   : > { %v1181_v62 = vsub.f32 1.0, %v1180_v57 }
 0x5ae   : > { %v1058_v56 = vmul.f32 %v1989_v48, %v1057_v53  ;;  %v1439_v53 = vld [vmem:[%s2644_s19 + $0x38] sm:$0xff] }
 0x5af   : > { %v1182_v6 = vmul.f32 %v1991_v52, %v1181_v62  ;;  %1456 = vmatpush.msra.mxu3 %v1439_v53 }
 0x5b1   : > { %v1183_v12 = vadd.f32 %v1991_v52, %v1182_v6 }
 0x5b3   : > { %v1187_v18 = vsel %vm1186_vm10, %v1991_v52, %v1183_v12 }
 0x5b4   : > { %v1192_v20 = vsel %vm1189_vm11, %v1191_v19, %v1187_v18  ;;  %v1433_v18 = vld [vmem:[%s2644_s19 + $0x8] sm:$0xff]  ;;  %v1432_v19 = vld [vmem:[%s2644_s19] sm:$0xff] }
 0x5b5   : > { %v1193_v21 = vmul.f32 %v2724_v35, %v1192_v20  ;;  %v1967_v35 = vld [vmem:[%s2950_s24] ss:$0 sm:$0xff] }
 0x5b6   : > { %v1970_v20 = vld [vmem:[%s820_s7] ss:$0 sm:$0xff] }
 0x5c3   : > { %1070 = vrot.lane.b32.xlu1 %v2687_v49, %s2301_s13  ;;  %v1059_v49 = vadd.f32 %v1989_v48, %v1058_v56  ;;  %v1437_v56 = vld [vmem:[%s2644_s19 + $0x28] sm:$0xff] }
 0x5c5   : > { %v1063_v8 = vsel %vm1062_vm5, %v1989_v48, %v1059_v49 }
 0x5c6   : > { %v1068_v11 = vsel %vm1065_vm6, %v1067_v10, %v1063_v8 }
 0x5c7   : > { %v1069_v16 = vmul.f32 %v2718_v29, %v1068_v11 }
 0x61d   : > { %v1280_v50 = vpop.xlane.xlu1 %1279 }
 0x61e   : > { %1992 = vrcp.f32 %v1280_v50  ;;  %v1292_v59 = vand.u32 2147483648, %v1280_v50  ;;  %v1290_v61 = vand.u32 2147483647, %v1280_v50  ;;  %vm1286_vm0 = vweird.f32 %v1280_v50 }
 0x620   : > { %v1293_v2 = vor.u32 1.1754944e-38, %v1292_v59  ;;  %vm1291_vm4 = vcmp.eq.f32.partialorder %v1290_v61, 8.507059e+37  ;;  %v1435_v61 = vld [vmem:[%s2644_s19 + $0x18] sm:$0xff] }
 0x624   : > { %v1993_v54 = vpop.eup %1992 }
 0x625   : > { %v1282_v55 = vmul.f32 %v1993_v54, %v1280_v50  ;;  %vm1287_vm14 = vweird.f32 %v1993_v54 }
 0x626   : > { %vm1288_vm2 = vmor %vm1286_vm0, %vm1287_vm14 }
 0x627   : > { %v1283_v58 = vsub.f32 1.0, %v1282_v55 }
 0x629   : > { %v1284_v60 = vmul.f32 %v1993_v54, %v1283_v58  ;;  %v1436_v58 = vld [vmem:[%s2644_s19 + $0x20] sm:$0xff] }
 0x62b   : > { %v1285_v63 = vadd.f32 %v1993_v54, %v1284_v60 }
 0x62d   : > { %v1289_v4 = vsel %vm1288_vm2, %v1993_v54, %v1285_v63  ;;  %v1438_v54 = vld [vmem:[%s2644_s19 + $0x30] sm:$0xff]  ;;  %vm1444_vm2 = vcmask 523264  }
 0x62e   : > { %v1294_v5 = vsel %vm1291_vm4, %v1293_v2, %v1289_v4  ;;  %1457 = vmatpush.msra.mxu3 %v1438_v54 }
 0x62f   : > { %v1295_v7 = vmul.f32 %v1987_v44, %v1294_v5  ;;  %v1402_v44 = vld [vmem:[%s2630_s17 + $0x10] sm:$0xff]  ;;  %v1968_v5 = vld [vmem:[%s834_s29] ss:$0 sm:$0xff] }
 0x630   : > { %1458 = vmatpush.msra.mxu3 %v1437_v56 }
 0x631   : > { %1816 = vmatmul.msk.f32.vlgmr.msrb.gmra.mxu0 %vm942_vm9, %v1295_v7 }
 0x632   : > { %1459 = vmatpush.msra.mxu3 %v1436_v58 }
 0x634   : > { %1460 = vmatpush.msra.mxu3 %v1435_v61 }
 0x635   : > { %v1071_v15 = vpop.permute.xlu1 %1070 }
 0x636   : > { %1091 = vmatpush.msrb.mxu2 %v1071_v15 }
 0x637   : > { %1807 = vmatmul.msk.f32.vlgmr.msrb.gmra.mxu2 %vm942_vm9, %v1069_v16 }
 0x638   : > { %1215 = vmatpush.msra.mxu2 %v1195_v17  ;;  %v1434_v17 = vld [vmem:[%s2644_s19 + $0x10] sm:$0xff]  ;;  %s2954_s19 = sld [smem:[#allocation21_spill]] }
 0x639   : > { %1461 = vmatpush.msra.mxu3 %v1434_v17 }
 0x63a   : > { %1340 = vmatpush.msrb.mxu2 %v935_v22 }
 0x63b   : > { %1462 = vmatpush.msra.mxu3 %v1433_v18 }
 0x63d   : > { %1463 = vmatpush.msra.mxu3 %v1432_v19 }
 0x63e   : > { %p1820_p8 = scmp.ne.s32.totalorder %s2954_s19, 1 }
 0x63f   : > { %1812 = vmatmul.msk.f32.vlgmr.msra.gmra.mxu2 %vm942_vm9, %v1193_v21  ;;  %s2955_s28 = sld [smem:[#allocation46_spill]] (!%p1820_p8) }
 0x640   : > { %s2956_s27 = sld [smem:[#allocation47_spill]] (!%p1820_p8) }
 0x6ae   : > { %v1319_v25 = vpop.f32.mrf.mxu0 }
 0x6af   : > { %1817 = vmatmul.msk.f32.vlgmr.msrb.gmra.mxu2 %vm942_vm9, %v1319_v25 }
 0x6ba   : > { %v1093_v26 = vpop.f32.mrf.mxu2 }
 0x6bb   : > { %1808 = vmatmul.msk.f32.vlgmr.msrb.gmra.mxu1 %vm942_vm9, %v1093_v26 }
 0x6bc   : > { %1423 = vmatpush.msrb.mxu1 %v1403_v43 }
 0x6be   : > { %1424 = vmatpush.msrb.mxu1 %v1402_v44 }
 0x6c2   : > { %v1217_v27 = vpop.f32.mrf.mxu2 }
 0x6c3   : > { %1813 = vmatmul.msk.f32.vlgmr.msra.gmra.mxu1 %vm942_vm9, %v1217_v27 }
 0x732   : > { %v1342_v32 = vpop.f32.mrf.mxu2 }
 0x738   : > { %v1116_v28 = vpop.f32.mrf.mxu1 }
 0x739   : > { %v1140_v29 = vadd.f32 %v2722_v34, %v1116_v28 }
 0x740   : > { %v1240_v30 = vpop.f32.mrf.mxu1 }
 0x741   : > { %v1243_v31 = vadd.f32 %v1240_v30, %v1140_v29 }
 0x743   : > { %v1345_v33 = vadd.f32 %v1342_v32, %v1243_v31 }
 0x745   : > { %v1346_v36 = vadd.f32 %v1345_v33, %v2661_v1  ;;  %v1401_v1 = vld [vmem:[%s2630_s17 + $0x8] sm:$0xff] }
 0x746   : > { %1425 = vmatpush.msrb.mxu1 %v1401_v1 }
 0x747   : > { %v2748_v37 = vadd.f32 %v1967_v35, %v1346_v36 }
 0x748   : > { %1426 = vmatpush.msrb.mxu1 %v1400_v45 }
 0x749   : > { %v1354_v38 = vsel %vm846_vm1, %v2748_v37, 0.0 }
 0x74a   : > { %1355 = vadd.xlane.f32.xlu1 %v1354_v38 }
 0x7bd   : > { %v1356_v39 = vpop.xlane.xlu1 %1355 }
 0x7be   : > { %v1357_v34 = vmul.f32 %v1356_v39, %v2665_v9 }
 0x7c0   : > { %v1358_v40 = vsub.f32 %v2748_v37, %v1357_v34 }
 0x7c2   : > { %v1359_v41 = vmul.f32 %v1358_v40, %v1358_v40  ;;  %v1394_v11 = vmul.f32 %v1968_v5, %v1358_v40 }
 0x7c4   : > { %v1360_v42 = vsel %vm846_vm1, %v1359_v41, 0.0 }
 0x7c5   : > { %1361 = vadd.xlane.f32.xlu0 %v1360_v42 }
 0x838   : > { %v1362_v46 = vpop.xlane.xlu0 %1361 }
 0x839   : > { %v1363_v47 = vmul.f32 0.032258064, %v1362_v46 }
 0x83b   : > { %1994 = vrsqrt.f32 %v1363_v47  ;;  %vm1371_vm9 = vcmp.eq.f32.partialorder %v1363_v47, inf  ;;  %v1374_v60 = vand.u32 2147483648, %v1363_v47  ;;  %vm1373_vm12 = vcmp.eq.f32.partialorder %v1363_v47, 0.0 }
 0x841   : > { %v1995_v48 = vpop.eup %1994 }
 0x842   : > { %v1365_v50 = vmul.f32 %v1995_v48, %v1363_v47 }
 0x844   : > { %v1366_v51 = vmul.f32 %v1995_v48, %v1365_v50 }
 0x846   : > { %v1367_v52 = vmul.f32 0.5, %v1366_v51 }
 0x848   : > { %v1368_v55 = vsub.f32 1.5, %v1367_v52 }
 0x84a   : > { %v1369_v57 = vmul.f32 %v1995_v48, %v1368_v55 }
 0x84c   : > { %v1370_v59 = vmul.f32 %v1369_v57, %v1363_v47 }
 0x84e   : > { %v1372_v49 = vsel %vm1371_vm9, %v1363_v47, %v1370_v59 }
 0x84f   : > { %v1375_v62 = vsel %vm1373_vm12, %v1374_v60, %v1372_v49 }
 0x850   : > { %v1376_v63 = vadd.f32 1e-06, %v1375_v62 }
 0x852   : > { %1996 = vrcp.f32 %v1376_v63  ;;  %v1388_v4 = vand.u32 2147483648, %v1376_v63  ;;  %v1386_v7 = vand.u32 2147483647, %v1376_v63  ;;  %vm1382_vm14 = vweird.f32 %v1376_v63 }
 0x854   : > { %v1389_v10 = vor.u32 1.1754944e-38, %v1388_v4  ;;  %vm1387_vm0 = vcmp.eq.f32.partialorder %v1386_v7, 8.507059e+37 }
 0x858   : > { %v1997_v0 = vpop.eup %1996 }
 0x859   : > { %v1378_v2 = vmul.f32 %v1997_v0, %v1376_v63  ;;  %vm1383_vm13 = vweird.f32 %v1997_v0 }
 0x85a   : > { %vm1384_vm15 = vmor %vm1382_vm14, %vm1383_vm13 }
 0x85b   : > { %v1379_v3 = vsub.f32 1.0, %v1378_v2 }
 0x85d   : > { %v1380_v6 = vmul.f32 %v1997_v0, %v1379_v3 }
 0x85f   : > { %v1381_v8 = vadd.f32 %v1997_v0, %v1380_v6 }
 0x861   : > { %v1385_v12 = vsel %vm1384_vm15, %v1997_v0, %v1381_v8 }
 0x862   : > { %v1390_v14 = vsel %vm1387_vm0, %v1389_v10, %v1385_v12 }
 0x863   : > { %v1395_v15 = vmul.f32 %v1394_v11, %v1390_v14 }
 0x865   : > { %v1399_v16 = vadd.f32 %v1969_v13, %v1395_v15 }
 0x867   : > { %1818 = vmatmul.msk.f32.vlgmr.msrb.gmra.mxu1 %vm846_vm1, %v1399_v16 }
 0x8e4   : > { %v1428_v21 = vpop.f32.mrf.mxu1 }
 0x8e5   : > { %v1429_v22 = vadd.f32 %v1970_v20, %v1428_v21 }
 0x8e7   : > { %v1431_v23 = vmax.f32 %v1429_v22, 0.0 }
 0x8e9   : > { %1819 = vmatmul.msk.f32.vlgmr.msra.gmra.mxu3 %vm1444_vm2, %v1431_v23 }
 0x96c   : > { %v1465_v25 = vpop.f32.mrf.mxu3 }
 0x96d   : > { %v1466_v26 = vadd.f32 %v1971_v24, %v1465_v25  ;;  %1473 = sbr.rel (%p1820_p8) target bundleno = 2705 (0xa91), region = 112 }
 0x96f   : > { %v1468_v27 = vadd.f32 %v1466_v26, %v2748_v37 }
 0x971   : > { %1469 = vst.msk [vmem:[#allocation2] sm:$0xff] %vm846_vm1, %v1468_v27 }
 0x972   : > { %v1476_v28 = vsel %vm846_vm1, %v1468_v27, 0.0  ;;  %v1998_v50 = vld [vmem:[%s2955_s28] ss:$0 sm:$0xff] }
 0x973   : > { %1477 = vadd.xlane.f32.xlu0 %v1476_v28  ;;  %v1999_v57 = vld [vmem:[%s2956_s27] ss:$0 sm:$0xff] }
 0x9e6   : > { %v1478_v29 = vpop.xlane.xlu0 %1477 }
 0x9e7   : > { %v1479_v30 = vmul.f32 %v1478_v29, %v2665_v9 }
 0x9e9   : > { %v1480_v31 = vsub.f32 %v1468_v27, %v1479_v30 }
 0x9eb   : > { %v1481_v32 = vmul.f32 %v1480_v31, %v1480_v31  ;;  %v1516_v55 = vmul.f32 %v1998_v50, %v1480_v31 }
 0x9ed   : > { %v1482_v33 = vsel %vm846_vm1, %v1481_v32, 0.0 }
 0x9ee   : > { %1483 = vadd.xlane.f32.xlu0 %v1482_v33 }
 0xa61   : > { %v1484_v35 = vpop.xlane.xlu0 %1483 }
 0xa62   : > { %v1485_v36 = vmul.f32 0.032258064, %v1484_v35 }
 0xa64   : > { %2000 = vrsqrt.f32 %v1485_v36  ;;  %vm1493_vm3 = vcmp.eq.f32.partialorder %v1485_v36, inf  ;;  %v1496_v43 = vand.u32 2147483648, %v1485_v36  ;;  %vm1495_vm4 = vcmp.eq.f32.partialorder %v1485_v36, 0.0 }
 0xa6a   : > { %v2001_v37 = vpop.eup %2000 }
 0xa6b   : > { %v1487_v38 = vmul.f32 %v2001_v37, %v1485_v36 }
 0xa6d   : > { %v1488_v39 = vmul.f32 %v2001_v37, %v1487_v38 }
 0xa6f   : > { %v1489_v34 = vmul.f32 0.5, %v1488_v39 }
 0xa71   : > { %v1490_v40 = vsub.f32 1.5, %v1489_v34 }
 0xa73   : > { %v1491_v41 = vmul.f32 %v2001_v37, %v1490_v40 }
 0xa75   : > { %v1492_v42 = vmul.f32 %v1491_v41, %v1485_v36 }
 0xa77   : > { %v1494_v44 = vsel %vm1493_vm3, %v1485_v36, %v1492_v42 }
 0xa78   : > { %v1497_v9 = vsel %vm1495_vm4, %v1496_v43, %v1494_v44 }
 0xa79   : > { %v1498_v1 = vadd.f32 1e-06, %v1497_v9 }
 0xa7b   : > { %2002 = vrcp.f32 %v1498_v1  ;;  %v1510_v48 = vand.u32 2147483648, %v1498_v1  ;;  %v1508_v52 = vand.u32 2147483647, %v1498_v1  ;;  %vm1504_vm6 = vweird.f32 %v1498_v1 }
 0xa7d   : > { %v1511_v54 = vor.u32 1.1754944e-38, %v1510_v48  ;;  %vm1509_vm8 = vcmp.eq.f32.partialorder %v1508_v52, 8.507059e+37 }
 0xa81   : > { %v2003_v45 = vpop.eup %2002 }
 0xa82   : > { %v1500_v46 = vmul.f32 %v2003_v45, %v1498_v1  ;;  %vm1505_vm5 = vweird.f32 %v2003_v45 }
 0xa83   : > { %vm1506_vm7 = vmor %vm1504_vm6, %vm1505_vm5 }
 0xa84   : > { %v1501_v47 = vsub.f32 1.0, %v1500_v46 }
 0xa86   : > { %v1502_v51 = vmul.f32 %v2003_v45, %v1501_v47 }
 0xa88   : > { %v1503_v53 = vadd.f32 %v2003_v45, %v1502_v51 }
 0xa8a   : > { %v1507_v56 = vsel %vm1506_vm7, %v2003_v45, %v1503_v53 }
 0xa8b   : > { %v1512_v58 = vsel %vm1509_vm8, %v1511_v54, %v1507_v56 }
 0xa8c   : > { %v1517_v59 = vmul.f32 %v1516_v55, %v1512_v58 }
 0xa8e   : > { %v1521_v60 = vadd.f32 %v1999_v57, %v1517_v59 }
 0xa90   : > { %1522 = vst.msk [vmem:[%s2657_s10] sm:$0xff] %vm846_vm1, %v1521_v60 }
 0xa91 PF: > { %s2957_s11 = sld [smem:[#allocation22_spill]]  ;;  %s1536_s15 = sshll.u32 %s2657_s10, 4  ;;  %s1537_s15 = int_to_ptr.vmem [resolvable:$true] %s1536_s15 }
 0xa92   : > { %s2958_s9 = sld [smem:[#allocation26_spill]]  ;;  %s1524_s13 = scalar_lea.sflag [#allocation5], %s2577_s4 }
 0xa93   : > { %s2959_s1 = sld [smem:[#allocation48_spill]] }
 0xa97   : > { %s1822_s14 = sshll.u32 %s2957_s11, 3 }
 0xa98   : > { %p2960_p10 = scmp.ne.s32.totalorder %s2958_s9, 0 }
 0xa99   : > { %s1534_s30 = scalar_lea.hbm %s2959_s1, %s1822_s14  ;;  %s2174_s29 = scalar_lea.hbm %s2959_s1, 16 }
 0xa9a   : > { %s1538_s5 = sshll.u32 %s1534_s30, 4  ;;  %s1539_s5 = int_to_ptr.hbm [resolvable:$true] %s1538_s5 }
 0xa9b   : > { %s2168_s24 = sshra.s32 %s1539_s5, 4  ;;  %s2169_s24 = int_to_ptr.hbm [resolvable:$true] %s2168_s24 }
 0xa9c   : > { %s2170_s17 = scalar_lea.hbm %s2169_s24, 8  ;;  %p2175_p2 = scmp.lt.s32.totalorder %s2169_s24, %s2959_s1 }
 0xa9d   : > { %p2171_p9 = scmp.ne.s32.totalorder %s2169_s24, %s2170_s17  ;;  %p2176_p4 = scmp.lt.s32.totalorder %s2174_s29, %s2170_s17 }
 0xa9f   : > { %p2172_p11 = pnand %p2171_p9, %p2960_p10  ;;  %p2177_p5 = por %p2176_p4, %p2175_p2 }
 0xaa1   : > { %p2173_p0 = pneg %p2172_p11 }
 0xaa3   : > { %p2178_p7 = pnand %p2177_p5, %p2173_p0 }
 0xaa5   : > { %2181 = shalt.err (!%p2178_p7)
}
 0xaa6   : > { %1839 = dma.vmem_to_hbm [thread:$0]  (%p2960_p10), %s1537_s15, 128, %s1539_s5, %s1524_s13  }
 0xaa7 PF: > { %s2961_s4 = sld [smem:[#allocation25_spill]] }
 0xaa8   : > { %s2962_s10 = sld [smem:[#allocation19_spill]] }
 0xaa9   : > { %s2963_s18 = sld [smem:[#allocation27_spill]] }
 0xaad   : > { %p1862_p12 = scmp.ge.s32.totalorder %s2961_s4, 2 }
 0xaae   : > { %s1550_s0 = sand.u32 1, %s2962_s10  }
 0xaaf   : > { %p2964_p13 = scmp.ne.s32.totalorder %s2963_s18, 0  ;;  %s1551_s12 = scalar_lea.sflag [#allocation5], %s1550_s0 }
 0xab1   : > { %p1858_p1 = pnand %p1862_p12, %p2964_p13 }
 0xab3   : > { %p1859_p3 = pneg %p1858_p1 }
 0xab5   : > { %2243 = dma.done.wait (%p1859_p3), %s1551_s12, 128  }
 0xab6   : > { %2245 = vsyncadd (%p1859_p3), %s1551_s12, 4294967168  ;;  %s38_s0 = sadd.s32 1, %s2961_s4   ;;  %s2965_s19 = sld [smem:[#allocation18_spill]] }
 0xab7   : > { %p35_p6 = scmp.ge.s32.totalorder %s38_s0, 6   ;;  %s2966_s23 = sld [smem:[#allocation30_spill]] }
 0xab8   : > { %s2967_s7 = sld [smem:[#allocation20_spill]]  ;;  %s2973_s21 = smov %s2252_s22 }
 0xab9   : > { %s2968_s26 = sld [smem:[#allocation31_spill]]  ;;  %s2975_s24 = smov %s2264_s25 }
 0xaba   : > { %s2969_s27 = sld [smem:[#allocation23_spill]]  ;;  %37 = sbr.rel (!%p35_p6) target bundleno = 31 (0x1f), region = 212 }
 0xabb   : > { %s2970_s28 = sld [smem:[#allocation24_spill]] }
 0xabc   : > { %s2971_s29 = sld [smem:[#allocation28_spill]]  ;;  %s2974_s22 = smov %s2965_s19 }
 0xabd   : > { %s2972_s30 = sld [smem:[#allocation29_spill]] }
 0xabe   : > { %s2976_s25 = smov %s2967_s7 }
 0xabf   :  { %1557 = vsyncpa [#allocation4], 1 }
 0xac0   :  { %1559 = vsyncpa [#allocation4 + $0x1], 1 }
 0xac1   :  { %1560 = vsyncpa [#allocation7], 1 }
 0xac2   :  { %1562 = vsyncpa [#allocation7 + $0x1], 1 }
 0xac3   :  { %1563 = vsyncpa [#allocation10], 1 }
 0xac4   :  { %1565 = vsyncpa [#allocation10 + $0x1], 1 }
 0xac5   :  { %1566 = vsyncpa [#allocation5], 1 }
 0xac6   :  { %1568 = vsyncpa [#allocation5 + $0x1], 1 }

</bundles_post_ra>
